<compile_context>
chip_gen: v7x
topology: tpu7x:2x2x1
jax: 0.10.0
libtpu: 0.0.40
codegen_flags: <defaults>
</compile_context>

<pallas_src>
import functools

import numpy as np
import jax
import jax.numpy as jnp
from jax.experimental import pallas as pl
from jax.experimental.pallas import tpu as pltpu


OC_PAD = 128  # conv output channels padded to a full 128-lane width


def _round_up(x, m):
    return ((x + m - 1) // m) * m


# ---------------------------------------------------------------------------
# Pallas kernel: a chain of  h = act_i(h @ W_i + b_i)  stages, evaluated in one
# kernel invocation with all operands resident in VMEM.  Used both for the
# per-conv matmul (single stage) and for the fused conv3+fc+mu head (4 stages).
# ---------------------------------------------------------------------------
def _matmul_chain_kernel(*refs, acts, scale):
    x_ref, o_ref = refs[0], refs[-1]
    h = x_ref[...]
    for i, act in enumerate(acts):
        w = refs[1 + 2 * i][...]
        b = refs[2 + 2 * i][...]
        h = jnp.dot(h, w, preferred_element_type=jnp.float32) + b
        if act == "relu":
            h = jnp.maximum(h, 0.0)
        elif act == "tanh":
            h = jnp.tanh(h)
    if scale != 1.0:
        h = h * scale
    o_ref[...] = h.astype(o_ref.dtype)


def pallas_matmul_chain(x, layers, scale=1.0, tile_m_max=512):
    """x: (M, K0); layers: list of (W (K,N), b (N,), act) -> (M, N_last) f32.

    M is tiled over a 1-D "parallel" grid; weights/biases are whole-array VMEM
    blocks resident across the grid.  M is padded to an exact multiple of the
    tile so every block exactly tiles its array (no partial blocks).
    """
    M, K0 = x.shape
    n_out = layers[-1][0].shape[1]

    tile_m = min(_round_up(max(M, 1), 8), tile_m_max)
    m_pad = _round_up(M, tile_m)
    if m_pad != M:
        x = jnp.pad(x, ((0, m_pad - M), (0, 0)))
    grid = (m_pad // tile_m,)

    in_specs = [pl.BlockSpec((tile_m, K0), lambda i: (i, 0))]
    args = [x]
    flops = 0
    bytes_accessed = int(x.size) * 4 + m_pad * n_out * 4
    for w, b, _ in layers:
        kw, n = w.shape
        in_specs.append(pl.BlockSpec((kw, n), lambda i: (0, 0)))
        in_specs.append(pl.BlockSpec((1, n), lambda i: (0, 0)))
        args.extend([w, b.reshape(1, n)])
        flops += 2 * m_pad * kw * n
        bytes_accessed += (int(w.size) + int(b.size)) * 4
    acts = tuple(a for _, _, a in layers)
    transcendentals = m_pad * n_out if acts[-1] == "tanh" else 0

    out = pl.pallas_call(
        functools.partial(_matmul_chain_kernel, acts=acts, scale=float(scale)),
        grid=grid,
        in_specs=in_specs,
        out_specs=pl.BlockSpec((tile_m, n_out), lambda i: (i, 0)),
        out_shape=jax.ShapeDtypeStruct((m_pad, n_out), jnp.float32),
        compiler_params=pltpu.CompilerParams(
            dimension_semantics=("parallel",),
            vmem_limit_bytes=32 * 1024 * 1024,
        ),
        cost_estimate=pl.CostEstimate(
            flops=flops,
            transcendentals=transcendentals,
            bytes_accessed=bytes_accessed,
        ),
    )(*args)
    if m_pad != M:
        out = out[:M]
    return out


# ---------------------------------------------------------------------------
# Conv2d (valid padding, stride) on NHWC inputs: strided-slice patch extraction
# (no gather, no NCHW round trip) + one Pallas matmul with fused bias+ReLU.
# Output channels are zero-padded to OC_PAD; the padding is carried into the
# next layer's K through zero weight rows (no slicing between layers).
# ---------------------------------------------------------------------------
def _extract_patches_nhwc(x, k, stride):
    B, H, W, C = x.shape
    Ho = (H - k) // stride + 1
    Wo = (W - k) // stride + 1
    cols = []
    for kh in range(k):
        for kw in range(k):
            cols.append(jax.lax.slice(
                x,
                (0, kh, kw, 0),
                (B, kh + stride * (Ho - 1) + 1, kw + stride * (Wo - 1) + 1, C),
                (1, stride, stride, 1)))
    # (B, Ho, Wo, k*k*C); feature order (kh, kw, c) matches the prepped weights.
    patches = jnp.concatenate(cols, axis=-1)
    return patches.reshape(B * Ho * Wo, k * k * C), Ho, Wo


def conv2d_nhwc(x, w, b, k, stride):
    """x: (B, H, W, C), w: (k*k*C, OCp), b: (OCp,) -> (B, Ho, Wo, OCp)."""
    B = x.shape[0]
    patches, Ho, Wo = _extract_patches_nhwc(x, k, stride)
    y = pallas_matmul_chain(patches, [(w, b, "relu")])
    return y.reshape(B, Ho, Wo, w.shape[1])


# ---------------------------------------------------------------------------
# Parameter init (mirrors torch orthogonal_/zeros) + one-time prep into the
# padded (K, N) matmul layouts used by the kernels.
# ---------------------------------------------------------------------------
def _conv_size(size, kernel_size, stride):
    return (size - (kernel_size - 1) - 1) // stride + 1


def _orthogonal(rng, shape, gain):
    rows = shape[0]
    cols = int(np.prod(shape[1:]))
    a = rng.standard_normal((rows, cols) if rows >= cols else (cols, rows))
    q, r = np.linalg.qr(a)
    q = q * np.sign(np.diag(r))
    if rows < cols:
        q = q.T
    return (gain * q[:rows, :cols]).astype(np.float32).reshape(shape)


def _prep_conv(w, b, c_in_pad, oc_pad):
    """torch (OC, C, k, k) -> ((k*k*c_in_pad), oc_pad) matmul layout, rows
    ordered (kh, kw, c) to match _extract_patches_nhwc; zero-padded."""
    OC, C, k, _ = w.shape
    wt = np.transpose(w, (2, 3, 1, 0))                      # (k, k, C, OC)
    wp = np.zeros((k, k, c_in_pad, oc_pad), np.float32)
    wp[:, :, :C, :OC] = wt
    bp = np.zeros((oc_pad,), np.float32)
    bp[:OC] = b
    return wp.reshape(k * k * c_in_pad, oc_pad), bp


def _prep_fc(w, h3, w3, c, c_pad):
    """torch fc weight (out, c*h3*w3) with (c, h, w) flatten order -> a
    ((h3*w3*c_pad), out) matrix matching the NHWC flatten of the padded conv3
    output used by the kernel path."""
    out_dim = w.shape[0]
    wr = w.reshape(out_dim, c, h3, w3)
    wr = np.transpose(wr, (2, 3, 1, 0))                     # (h, w, c, out)
    wp = np.zeros((h3, w3, c_pad, out_dim), np.float32)
    wp[:, :, :c, :] = wr
    return wp.reshape(h3 * w3 * c_pad, out_dim)


def init_actor_params(s_dim, a_dim, emb_dim=512, seed=0):
    rng = np.random.RandomState(seed)
    g2 = float(np.sqrt(2.0))
    C_in, H, W = s_dim
    h3 = _conv_size(_conv_size(_conv_size(H, 8, 4), 4, 2), 3, 1)
    w3 = _conv_size(_conv_size(_conv_size(W, 8, 4), 4, 2), 3, 1)

    torch_p = {  # PyTorch-layout parameters (for the pure-JAX reference check)
        "conv1_w": _orthogonal(rng, (32, C_in, 8, 8), g2),
        "conv1_b": np.zeros((32,), np.float32),
        "conv2_w": _orthogonal(rng, (64, 32, 4, 4), g2),
        "conv2_b": np.zeros((64,), np.float32),
        "conv3_w": _orthogonal(rng, (64, 64, 3, 3), g2),
        "conv3_b": np.zeros((64,), np.float32),
        "fc_w": _orthogonal(rng, (emb_dim, h3 * w3 * 64), g2),
        "fc_b": np.zeros((emb_dim,), np.float32),
        "mu1_w": _orthogonal(rng, (100, emb_dim), 0.01),
        "mu1_b": np.zeros((100,), np.float32),
        "mu2_w": _orthogonal(rng, (a_dim, 100), 0.01),
        "mu2_b": np.zeros((a_dim,), np.float32),
        "log_var": np.zeros((1, a_dim), np.float32),
    }

    c1w, c1b = _prep_conv(torch_p["conv1_w"], torch_p["conv1_b"], C_in, OC_PAD)
    c2w, c2b = _prep_conv(torch_p["conv2_w"], torch_p["conv2_b"], OC_PAD, OC_PAD)
    c3w, c3b = _prep_conv(torch_p["conv3_w"], torch_p["conv3_b"], OC_PAD, OC_PAD)
    fcw = _prep_fc(torch_p["fc_w"], h3, w3, 64, OC_PAD)

    kernel_p = {
        "conv1_w": c1w, "conv1_b": c1b,
        "conv2_w": c2w, "conv2_b": c2b,
        "conv3_w": c3w, "conv3_b": c3b,
        "fc_w": fcw, "fc_b": torch_p["fc_b"],
        "mu1_w": np.ascontiguousarray(torch_p["mu1_w"].T), "mu1_b": torch_p["mu1_b"],
        "mu2_w": np.ascontiguousarray(torch_p["mu2_w"].T), "mu2_b": torch_p["mu2_b"],
        "log_var": torch_p["log_var"],
    }
    kernel_p = {k: jnp.asarray(v) for k, v in kernel_p.items()}
    torch_p = {k: jnp.asarray(v) for k, v in torch_p.items()}
    return kernel_p, torch_p


# ---------------------------------------------------------------------------
# Actor forward: returns (mu, exp(var)) just like the PyTorch module.
# ---------------------------------------------------------------------------
def actor_forward(params, s, a_max=1.0):
    # PyTorch feeds NCHW; convert once to NHWC and stay there.
    x = jnp.transpose(s, (0, 2, 3, 1))
    x = conv2d_nhwc(x, params["conv1_w"], params["conv1_b"], k=8, stride=4)
    x = conv2d_nhwc(x, params["conv2_w"], params["conv2_b"], k=4, stride=2)
    B, H2, W2, Cp = x.shape
    H3, W3 = H2 - 3 + 1, W2 - 3 + 1

    if H3 == 1 and W3 == 1:
        # conv3's single 3x3 patch is exactly the NHWC flatten of conv2's
        # output, so conv3 + flatten + fc + mu1 + mu2*tanh fuse into ONE call.
        feats = x.reshape(B, H2 * W2 * Cp)
        head = [
            (params["conv3_w"], params["conv3_b"], "relu"),
            (params["fc_w"], params["fc_b"], "relu"),
            (params["mu1_w"], params["mu1_b"], "relu"),
            (params["mu2_w"], params["mu2_b"], "tanh"),
        ]
    else:
        x = conv2d_nhwc(x, params["conv3_w"], params["conv3_b"], k=3, stride=1)
        feats = x.reshape(B, -1)          # NHWC flatten; fc_w was prepped to match
        head = [
            (params["fc_w"], params["fc_b"], "relu"),
            (params["mu1_w"], params["mu1_b"], "relu"),
            (params["mu2_w"], params["mu2_b"], "tanh"),
        ]

    mu = pallas_matmul_chain(feats, head, scale=a_max)
    std = jnp.exp(params["log_var"])      # torch.exp(self.var)
    return mu, std


# ---------------------------------------------------------------------------
# Pure-JAX reference (NCHW, torch-layout weights) for a correctness check.
# ---------------------------------------------------------------------------
def _reference_forward(tp, s, a_max=1.0):
    def conv(x, w, b, stride):
        y = jax.lax.conv_general_dilated(
            x, w, (stride, stride), "VALID",
            dimension_numbers=("NCHW", "OIHW", "NCHW"))
        return jnp.maximum(y + b[None, :, None, None], 0.0)

    x = conv(s, tp["conv1_w"], tp["conv1_b"], 4)
    x = conv(x, tp["conv2_w"], tp["conv2_b"], 2)
    x = conv(x, tp["conv3_w"], tp["conv3_b"], 1)
    x = x.reshape(s.shape[0], -1)
    x = jnp.maximum(x @ tp["fc_w"].T + tp["fc_b"], 0.0)
    h = jnp.maximum(x @ tp["mu1_w"].T + tp["mu1_b"], 0.0)
    return jnp.tanh(h @ tp["mu2_w"].T + tp["mu2_b"]) * a_max


if __name__ == "__main__":
    # Three valid convs (8/4, 4/2, 3/1) need spatial >= 36: s_dim = (4, 36, 36).
    s_dim = (4, 36, 36)
    a_dim = 4
    batch = 2

    kparams, tparams = init_actor_params(s_dim, a_dim, emb_dim=512, seed=0)
    s = jax.random.normal(jax.random.PRNGKey(0), (batch,) + s_dim, dtype=jnp.float32)

    fwd = jax.jit(functools.partial(actor_forward, a_max=1.0))
    mu, std = fwd(kparams, s)
    jax.block_until_ready((mu, std))

    assert mu.shape == (batch, a_dim), mu.shape
    assert std.shape == (1, a_dim), std.shape
    assert bool(jnp.all(jnp.isfinite(mu))) and bool(jnp.all(std == 1.0))

    # Cross-check against the pure-JAX NCHW reference (layout fidelity check).
    mu_ref = _reference_forward(tparams, s, a_max=1.0)
    np.testing.assert_allclose(np.asarray(mu), np.asarray(mu_ref),
                               rtol=5e-2, atol=1e-3)

    print("KERNEL_OK")
</pallas_src>

<mosaic_0001>
module attributes {stable_mosaic.version = 11 : i64} {
  func.func @_matmul_chain_kernel(%arg0: i32, %arg1: memref<128x256xf32, #tpu.memory_space<vmem>>, %arg2: memref<256x128xf32, #tpu.memory_space<vmem>>, %arg3: memref<1x128xf32, #tpu.memory_space<vmem>>, %arg4: memref<128x128xf32, #tpu.memory_space<vmem>>) attributes {dimension_semantics = [#tpu.dimension_semantics<parallel>], iteration_bounds = array<i64: 1>, scalar_prefetch = 0 : i64, scratch_operands = 0 : i64, tpu.core_type = #tpu.core_type<tc>, window_params = [{transform_indices = @transform_0, window_bounds = array<i64: 128, 256>}, {pipeline_mode = #tpu.pipeline_mode<synchronous>, transform_indices = @transform_1, window_bounds = array<i64: 256, 128>}, {pipeline_mode = #tpu.pipeline_mode<synchronous>, transform_indices = @transform_2, window_bounds = array<i64: 1, 128>}, {transform_indices = @transform_3, window_bounds = array<i64: 128, 128>}]} {
    %c0 = arith.constant 0 : index
    %c0_0 = arith.constant 0 : index
    %0 = vector.load %arg1[%c0, %c0_0] : memref<128x256xf32, #tpu.memory_space<vmem>>, vector<128x256xf32>
    %c0_1 = arith.constant 0 : index
    %c0_2 = arith.constant 0 : index
    %1 = vector.load %arg2[%c0_1, %c0_2] : memref<256x128xf32, #tpu.memory_space<vmem>>, vector<256x128xf32>
    %c0_3 = arith.constant 0 : index
    %c0_4 = arith.constant 0 : index
    %2 = vector.load %arg3[%c0_3, %c0_4] : memref<1x128xf32, #tpu.memory_space<vmem>>, vector<1x128xf32>
    %cst = arith.constant dense<0.000000e+00> : vector<128x128xf32>
    %3 = tpu.matmul %0, %1, %cst {dimension_numbers = #tpu.dot_dimension_numbers<[1], [0], [0], [1], [0, 0, 1, 1], [], []>} : vector<128x256xf32>, vector<256x128xf32>, vector<128x128xf32> -> vector<128x128xf32>
    %4 = vector.broadcast %2 : vector<1x128xf32> to vector<128x128xf32>
    %5 = arith.addf %3, %4 : vector<128x128xf32>
    %cst_5 = arith.constant 0.000000e+00 : f32
    %6 = vector.broadcast %cst_5 : f32 to vector<128x128xf32>
    %7 = arith.maximumf %5, %6 : vector<128x128xf32>
    %c0_6 = arith.constant 0 : index
    %c0_7 = arith.constant 0 : index
    %8 = vector.load %arg4[%c0_6, %c0_7] : memref<128x128xf32, #tpu.memory_space<vmem>>, vector<128x128xf32>
    tpu.vector_store %arg4[%c0_6, %c0_7], %7 {strides = array<i32>} : memref<128x128xf32, #tpu.memory_space<vmem>>, vector<128x128xf32>,
    return
  }
  func.func @transform_0(%arg0: i32) -> (i32, i32) {
    %c0_i32 = arith.constant 0 : i32
    %c0_i32_0 = arith.constant 0 : i32
    return %arg0, %c0_i32 : i32, i32
  }
  func.func @transform_1(%arg0: i32) -> (i32, i32) {
    %c0_i32 = arith.constant 0 : i32
    %c0_i32_0 = arith.constant 0 : i32
    %c0_i32_1 = arith.constant 0 : i32
    return %c0_i32, %c0_i32_0 : i32, i32
  }
  func.func @transform_2(%arg0: i32) -> (i32, i32) {
    %c0_i32 = arith.constant 0 : i32
    %c0_i32_0 = arith.constant 0 : i32
    %c0_i32_1 = arith.constant 0 : i32
    return %c0_i32, %c0_i32_0 : i32, i32
  }
  func.func @transform_3(%arg0: i32) -> (i32, i32) {
    %c0_i32 = arith.constant 0 : i32
    %c0_i32_0 = arith.constant 0 : i32
    return %arg0, %c0_i32 : i32, i32
  }
}

module attributes {stable_mosaic.version = 11 : i64} {
  func.func @_matmul_chain_kernel(%arg0: i32, %arg1: memref<24x2048xf32, #tpu.memory_space<vmem>>, %arg2: memref<2048x128xf32, #tpu.memory_space<vmem>>, %arg3: memref<1x128xf32, #tpu.memory_space<vmem>>, %arg4: memref<24x128xf32, #tpu.memory_space<vmem>>) attributes {dimension_semantics = [#tpu.dimension_semantics<parallel>], iteration_bounds = array<i64: 1>, scalar_prefetch = 0 : i64, scratch_operands = 0 : i64, tpu.core_type = #tpu.core_type<tc>, window_params = [{transform_indices = @transform_0, window_bounds = array<i64: 24, 2048>}, {pipeline_mode = #tpu.pipeline_mode<synchronous>, transform_indices = @transform_1, window_bounds = array<i64: 2048, 128>}, {pipeline_mode = #tpu.pipeline_mode<synchronous>, transform_indices = @transform_2, window_bounds = array<i64: 1, 128>}, {transform_indices = @transform_3, window_bounds = array<i64: 24, 128>}]} {
    %c0 = arith.constant 0 : index
    %c0_0 = arith.constant 0 : index
    %0 = vector.load %arg1[%c0, %c0_0] : memref<24x2048xf32, #tpu.memory_space<vmem>>, vector<24x2048xf32>
    %c0_1 = arith.constant 0 : index
    %c0_2 = arith.constant 0 : index
    %1 = vector.load %arg2[%c0_1, %c0_2] : memref<2048x128xf32, #tpu.memory_space<vmem>>, vector<2048x128xf32>
    %c0_3 = arith.constant 0 : index
    %c0_4 = arith.constant 0 : index
    %2 = vector.load %arg3[%c0_3, %c0_4] : memref<1x128xf32, #tpu.memory_space<vmem>>, vector<1x128xf32>
    %cst = arith.constant dense<0.000000e+00> : vector<24x128xf32>
    %3 = tpu.matmul %0, %1, %cst {dimension_numbers = #tpu.dot_dimension_numbers<[1], [0], [0], [1], [0, 0, 1, 1], [], []>} : vector<24x2048xf32>, vector<2048x128xf32>, vector<24x128xf32> -> vector<24x128xf32>
    %4 = vector.broadcast %2 : vector<1x128xf32> to vector<24x128xf32>
    %5 = arith.addf %3, %4 : vector<24x128xf32>
    %cst_5 = arith.constant 0.000000e+00 : f32
    %6 = vector.broadcast %cst_5 : f32 to vector<24x128xf32>
    %7 = arith.maximumf %5, %6 : vector<24x128xf32>
    %c0_6 = arith.constant 0 : index
    %c0_7 = arith.constant 0 : index
    %8 = vector.load %arg4[%c0_6, %c0_7] : memref<24x128xf32, #tpu.memory_space<vmem>>, vector<24x128xf32>
    tpu.vector_store %arg4[%c0_6, %c0_7], %7 {strides = array<i32>} : memref<24x128xf32, #tpu.memory_space<vmem>>, vector<24x128xf32>,
    return
  }
  func.func @transform_0(%arg0: i32) -> (i32, i32) {
    %c0_i32 = arith.constant 0 : i32
    %c0_i32_0 = arith.constant 0 : i32
    return %arg0, %c0_i32 : i32, i32
  }
  func.func @transform_1(%arg0: i32) -> (i32, i32) {
    %c0_i32 = arith.constant 0 : i32
    %c0_i32_0 = arith.constant 0 : i32
    %c0_i32_1 = arith.constant 0 : i32
    return %c0_i32, %c0_i32_0 : i32, i32
  }
  func.func @transform_2(%arg0: i32) -> (i32, i32) {
    %c0_i32 = arith.constant 0 : i32
    %c0_i32_0 = arith.constant 0 : i32
    %c0_i32_1 = arith.constant 0 : i32
    return %c0_i32, %c0_i32_0 : i32, i32
  }
  func.func @transform_3(%arg0: i32) -> (i32, i32) {
    %c0_i32 = arith.constant 0 : i32
    %c0_i32_0 = arith.constant 0 : i32
    return %arg0, %c0_i32 : i32, i32
  }
}

module attributes {stable_mosaic.version = 11 : i64} {
  func.func @_matmul_chain_kernel(%arg0: i32, %arg1: memref<8x1152xf32, #tpu.memory_space<vmem>>, %arg2: memref<1152x128xf32, #tpu.memory_space<vmem>>, %arg3: memref<1x128xf32, #tpu.memory_space<vmem>>, %arg4: memref<128x512xf32, #tpu.memory_space<vmem>>, %arg5: memref<1x512xf32, #tpu.memory_space<vmem>>, %arg6: memref<512x100xf32, #tpu.memory_space<vmem>>, %arg7: memref<1x100xf32, #tpu.memory_space<vmem>>, %arg8: memref<100x4xf32, #tpu.memory_space<vmem>>, %arg9: memref<1x4xf32, #tpu.memory_space<vmem>>, %arg10: memref<8x4xf32, #tpu.memory_space<vmem>>) attributes {dimension_semantics = [#tpu.dimension_semantics<parallel>], iteration_bounds = array<i64: 1>, scalar_prefetch = 0 : i64, scratch_operands = 0 : i64, tpu.core_type = #tpu.core_type<tc>, window_params = [{transform_indices = @transform_0, window_bounds = array<i64: 8, 1152>}, {pipeline_mode = #tpu.pipeline_mode<synchronous>, transform_indices = @transform_1, window_bounds = array<i64: 1152, 128>}, {pipeline_mode = #tpu.pipeline_mode<synchronous>, transform_indices = @transform_2, window_bounds = array<i64: 1, 128>}, {pipeline_mode = #tpu.pipeline_mode<synchronous>, transform_indices = @transform_3, window_bounds = array<i64: 128, 512>}, {pipeline_mode = #tpu.pipeline_mode<synchronous>, transform_indices = @transform_4, window_bounds = array<i64: 1, 512>}, {pipeline_mode = #tpu.pipeline_mode<synchronous>, transform_indices = @transform_5, window_bounds = array<i64: 512, 100>}, {pipeline_mode = #tpu.pipeline_mode<synchronous>, transform_indices = @transform_6, window_bounds = array<i64: 1, 100>}, {pipeline_mode = #tpu.pipeline_mode<synchronous>, transform_indices = @transform_7, window_bounds = array<i64: 100, 4>}, {pipeline_mode = #tpu.pipeline_mode<synchronous>, transform_indices = @transform_8, window_bounds = array<i64: 1, 4>}, {transform_indices = @transform_9, window_bounds = array<i64: 8, 4>}]} {
    %c0 = arith.constant 0 : index
    %c0_0 = arith.constant 0 : index
    %0 = vector.load %arg1[%c0, %c0_0] : memref<8x1152xf32, #tpu.memory_space<vmem>>, vector<8x1152xf32>
    %c0_1 = arith.constant 0 : index
    %c0_2 = arith.constant 0 : index
    %1 = vector.load %arg2[%c0_1, %c0_2] : memref<1152x128xf32, #tpu.memory_space<vmem>>, vector<1152x128xf32>
    %c0_3 = arith.constant 0 : index
    %c0_4 = arith.constant 0 : index
    %2 = vector.load %arg3[%c0_3, %c0_4] : memref<1x128xf32, #tpu.memory_space<vmem>>, vector<1x128xf32>
    %cst = arith.constant dense<0.000000e+00> : vector<8x128xf32>
    %3 = tpu.matmul %0, %1, %cst {dimension_numbers = #tpu.dot_dimension_numbers<[1], [0], [0], [1], [0, 0, 1, 1], [], []>} : vector<8x1152xf32>, vector<1152x128xf32>, vector<8x128xf32> -> vector<8x128xf32>
    %4 = vector.broadcast %2 : vector<1x128xf32> to vector<8x128xf32>
    %5 = arith.addf %3, %4 : vector<8x128xf32>
    %cst_5 = arith.constant 0.000000e+00 : f32
    %6 = vector.broadcast %cst_5 : f32 to vector<8x128xf32>
    %7 = arith.maximumf %5, %6 : vector<8x128xf32>
    %c0_6 = arith.constant 0 : index
    %c0_7 = arith.constant 0 : index
    %8 = vector.load %arg4[%c0_6, %c0_7] : memref<128x512xf32, #tpu.memory_space<vmem>>, vector<128x512xf32>
    %c0_8 = arith.constant 0 : index
    %c0_9 = arith.constant 0 : index
    %9 = vector.load %arg5[%c0_8, %c0_9] : memref<1x512xf32, #tpu.memory_space<vmem>>, vector<1x512xf32>
    %cst_10 = arith.constant dense<0.000000e+00> : vector<8x512xf32>
    %10 = tpu.matmul %7, %8, %cst_10 {dimension_numbers = #tpu.dot_dimension_numbers<[1], [0], [0], [1], [0, 0, 1, 1], [], []>} : vector<8x128xf32>, vector<128x512xf32>, vector<8x512xf32> -> vector<8x512xf32>
    %11 = vector.broadcast %9 : vector<1x512xf32> to vector<8x512xf32>
    %12 = arith.addf %10, %11 : vector<8x512xf32>
    %cst_11 = arith.constant 0.000000e+00 : f32
    %13 = vector.broadcast %cst_11 : f32 to vector<8x512xf32>
    %14 = arith.maximumf %12, %13 : vector<8x512xf32>
    %c0_12 = arith.constant 0 : index
    %c0_13 = arith.constant 0 : index
    %15 = vector.load %arg6[%c0_12, %c0_13] : memref<512x100xf32, #tpu.memory_space<vmem>>, vector<512x100xf32>
    %c0_14 = arith.constant 0 : index
    %c0_15 = arith.constant 0 : index
    %16 = vector.load %arg7[%c0_14, %c0_15] : memref<1x100xf32, #tpu.memory_space<vmem>>, vector<1x100xf32>
    %cst_16 = arith.constant dense<0.000000e+00> : vector<8x100xf32>
    %17 = tpu.matmul %14, %15, %cst_16 {dimension_numbers = #tpu.dot_dimension_numbers<[1], [0], [0], [1], [0, 0, 1, 1], [], []>} : vector<8x512xf32>, vector<512x100xf32>, vector<8x100xf32> -> vector<8x100xf32>
    %18 = vector.broadcast %16 : vector<1x100xf32> to vector<8x100xf32>
    %19 = arith.addf %17, %18 : vector<8x100xf32>
    %cst_17 = arith.constant 0.000000e+00 : f32
    %20 = vector.broadcast %cst_17 : f32 to vector<8x100xf32>
    %21 = arith.maximumf %19, %20 : vector<8x100xf32>
    %c0_18 = arith.constant 0 : index
    %c0_19 = arith.constant 0 : index
    %22 = vector.load %arg8[%c0_18, %c0_19] : memref<100x4xf32, #tpu.memory_space<vmem>>, vector<100x4xf32>
    %c0_20 = arith.constant 0 : index
    %c0_21 = arith.constant 0 : index
    %23 = vector.load %arg9[%c0_20, %c0_21] : memref<1x4xf32, #tpu.memory_space<vmem>>, vector<1x4xf32>
    %cst_22 = arith.constant dense<0.000000e+00> : vector<8x4xf32>
    %24 = tpu.matmul %21, %22, %cst_22 {dimension_numbers = #tpu.dot_dimension_numbers<[1], [0], [0], [1], [0, 0, 1, 1], [], []>} : vector<8x100xf32>, vector<100x4xf32>, vector<8x4xf32> -> vector<8x4xf32>
    %25 = vector.broadcast %23 : vector<1x4xf32> to vector<8x4xf32>
    %26 = arith.addf %24, %25 : vector<8x4xf32>
    %27 = math.tanh %26 : vector<8x4xf32>
    %c0_23 = arith.constant 0 : index
    %c0_24 = arith.constant 0 : index
    %28 = vector.load %arg10[%c0_23, %c0_24] : memref<8x4xf32, #tpu.memory_space<vmem>>, vector<8x4xf32>
    tpu.vector_store %arg10[%c0_23, %c0_24], %27 {strides = array<i32>} : memref<8x4xf32, #tpu.memory_space<vmem>>, vector<8x4xf32>,
    return
  }
  func.func @transform_0(%arg0: i32) -> (i32, i32) {
    %c0_i32 = arith.constant 0 : i32
    %c0_i32_0 = arith.constant 0 : i32
    return %arg0, %c0_i32 : i32, i32
  }
  func.func @transform_1(%arg0: i32) -> (i32, i32) {
    %c0_i32 = arith.constant 0 : i32
    %c0_i32_0 = arith.constant 0 : i32
    %c0_i32_1 = arith.constant 0 : i32
    return %c0_i32, %c0_i32_0 : i32, i32
  }
  func.func @transform_2(%arg0: i32) -> (i32, i32) {
    %c0_i32 = arith.constant 0 : i32
    %c0_i32_0 = arith.constant 0 : i32
    %c0_i32_1 = arith.constant 0 : i32
    return %c0_i32, %c0_i32_0 : i32, i32
  }
  func.func @transform_3(%arg0: i32) -> (i32, i32) {
    %c0_i32 = arith.constant 0 : i32
    %c0_i32_0 = arith.constant 0 : i32
    %c0_i32_1 = arith.constant 0 : i32
    return %c0_i32, %c0_i32_0 : i32, i32
  }
  func.func @transform_4(%arg0: i32) -> (i32, i32) {
    %c0_i32 = arith.constant 0 : i32
    %c0_i32_0 = arith.constant 0 : i32
    %c0_i32_1 = arith.constant 0 : i32
    return %c0_i32, %c0_i32_0 : i32, i32
  }
  func.func @transform_5(%arg0: i32) -> (i32, i32) {
    %c0_i32 = arith.constant 0 : i32
    %c0_i32_0 = arith.constant 0 : i32
    %c0_i32_1 = arith.constant 0 : i32
    return %c0_i32, %c0_i32_0 : i32, i32
  }
  func.func @transform_6(%arg0: i32) -> (i32, i32) {
    %c0_i32 = arith.constant 0 : i32
    %c0_i32_0 = arith.constant 0 : i32
    %c0_i32_1 = arith.constant 0 : i32
    return %c0_i32, %c0_i32_0 : i32, i32
  }
  func.func @transform_7(%arg0: i32) -> (i32, i32) {
    %c0_i32 = arith.constant 0 : i32
    %c0_i32_0 = arith.constant 0 : i32
    %c0_i32_1 = arith.constant 0 : i32
    return %c0_i32, %c0_i32_0 : i32, i32
  }
  func.func @transform_8(%arg0: i32) -> (i32, i32) {
    %c0_i32 = arith.constant 0 : i32
    %c0_i32_0 = arith.constant 0 : i32
    %c0_i32_1 = arith.constant 0 : i32
    return %c0_i32, %c0_i32_0 : i32, i32
  }
  func.func @transform_9(%arg0: i32) -> (i32, i32) {
    %c0_i32 = arith.constant 0 : i32
    %c0_i32_0 = arith.constant 0 : i32
    return %arg0, %c0_i32 : i32, i32
  }
}

</mosaic_0001>

<bundles_post_ra>
// kernel: actor_forward.3
= control target key start
LH: loop header
LB: loop body
LE: loop exit
PB: predicated region body
PF: predicated region fallthrough
CT: control target
= control target key end

     0   :  { %s676_s1 = inlined_call_operand.vmem [shape: f32[256,128], index: 1, kind: input, shape index: {}]   ;;  %s677_s0 = inlined_call_operand.vmem [shape: f32[128,256], index: 0, kind: input, shape index: {}]   ;;  %s678_s2 = inlined_call_operand.vmem [shape: f32[1,128], index: 2, kind: input, shape index: {}]   ;;  %s679_s3 = inlined_call_operand.vmem [shape: f32[128,128], index: 3, kind: output, shape index: {}]  }
   0x1   :  { %v62_v0 = vld [vmem:[%s676_s1 + $0x80] sm:$0xff]  ;;  %v63_v1 = vld [vmem:[%s676_s1 + $0x88] sm:$0xff]  ;;  %v64_v5 = vld [vmem:[%s676_s1 + $0x90] sm:$0xff] }
   0x2   :  { %v46_v2 = vld [vmem:[%s676_s1] sm:$0xff]  ;;  %v347_v3 = vpack.c.bf16 %v63_v1, %v62_v0  ;;  %v47_v4 = vld [vmem:[%s676_s1 + $0x8] sm:$0xff]  ;;  %v65_v6 = vld [vmem:[%s676_s1 + $0x98] sm:$0xff] }
   0x3   :  { %v349_v7 = vpack.c.bf16 %v47_v4, %v46_v2  ;;  %v351_v8 = vpack.c.bf16 %v65_v6, %v64_v5  ;;  %v48_v9 = vld [vmem:[%s676_s1 + $0x10] sm:$0xff]  ;;  %v49_v10 = vld [vmem:[%s676_s1 + $0x18] sm:$0xff]  ;;  %v66_v11 = vld [vmem:[%s676_s1 + $0xa0] sm:$0xff] }
   0x4   :  { %348 = vmatprep.subr.bf16.mxu0 %v347_v3  ;;  %379 = vmatprep.subr.bf16.mxu1 %v347_v3  ;;  %v67_v12 = vld [vmem:[%s676_s1 + $0xa8] sm:$0xff]  ;;  %v353_v13 = vpack.c.bf16 %v49_v10, %v48_v9  ;;  %v50_v15 = vld [vmem:[%s676_s1 + $0x20] sm:$0xff]  ;;  %v68_v17 = vld [vmem:[%s676_s1 + $0xb0] sm:$0xff] }
   0x5   :  { %350 = vmatpush3.bf16.msra.mxu0 %v349_v7  ;;  %387 = vmatpush3.bf16.msra.mxu1 %v349_v7  ;;  %v355_v14 = vpack.c.bf16 %v67_v12, %v66_v11  ;;  %v51_v16 = vld [vmem:[%s676_s1 + $0x28] sm:$0xff]  ;;  %v69_v18 = vld [vmem:[%s676_s1 + $0xb8] sm:$0xff]  ;;  %v52_v21 = vld [vmem:[%s676_s1 + $0x30] sm:$0xff] }
   0x6   :  { %352 = vmatprep.subr.bf16.mxu0 %v351_v8  ;;  %380 = vmatprep.subr.bf16.mxu1 %v351_v8  ;;  %v357_v19 = vpack.c.bf16 %v51_v16, %v50_v15  ;;  %v359_v20 = vpack.c.bf16 %v69_v18, %v68_v17  ;;  %v53_v22 = vld [vmem:[%s676_s1 + $0x38] sm:$0xff]  ;;  %v70_v23 = vld [vmem:[%s676_s1 + $0xc0] sm:$0xff]  ;;  %v71_v24 = vld [vmem:[%s676_s1 + $0xc8] sm:$0xff] }
   0x7   :  { %v15_v25 = vld [vmem:[%s677_s0 + $0x8] sm:$0xff]  ;;  %v361_v27 = vpack.c.bf16 %v53_v22, %v52_v21  ;;  %v363_v28 = vpack.c.bf16 %v71_v24, %v70_v23  ;;  %v54_v29 = vld [vmem:[%s676_s1 + $0x40] sm:$0xff]  ;;  %v72_v31 = vld [vmem:[%s676_s1 + $0xd0] sm:$0xff] }
   0x8   :  { %149 = vmatprep.mubr.f32.mxu0 %v15_v25  ;;  %v31_v26 = vld [vmem:[%s677_s0 + $0x88] sm:$0xff]  ;;  %v73_v32 = vld [vmem:[%s676_s1 + $0xd8] sm:$0xff]  ;;  %v56_v35 = vld [vmem:[%s676_s1 + $0x50] sm:$0xff] }
   0x9   :  { %354 = vmatpush3.bf16.msra.mxu0 %v353_v13  ;;  %388 = vmatpush3.bf16.msra.mxu1 %v353_v13  ;;  %v55_v30 = vld [vmem:[%s676_s1 + $0x48] sm:$0xff]  ;;  %v367_v34 = vpack.c.bf16 %v73_v32, %v72_v31  ;;  %v57_v36 = vld [vmem:[%s676_s1 + $0x58] sm:$0xff]  ;;  %v74_v37 = vld [vmem:[%s676_s1 + $0xe0] sm:$0xff] }
   0xa   :  { %356 = vmatprep.subr.bf16.mxu0 %v355_v14  ;;  %381 = vmatprep.subr.bf16.mxu1 %v355_v14  ;;  %v365_v33 = vpack.c.bf16 %v55_v30, %v54_v29  ;;  %v75_v38 = vld [vmem:[%s676_s1 + $0xe8] sm:$0xff]  ;;  %v369_v39 = vpack.c.bf16 %v57_v36, %v56_v35  ;;  %v58_v41 = vld [vmem:[%s676_s1 + $0x60] sm:$0xff]  ;;  %v76_v43 = vld [vmem:[%s676_s1 + $0xf0] sm:$0xff] }
   0xb   :  { %189 = vmatprep.mubr.f32.mxu1 %v31_v26  ;;  %v371_v40 = vpack.c.bf16 %v75_v38, %v74_v37  ;;  %v59_v42 = vld [vmem:[%s676_s1 + $0x68] sm:$0xff]  ;;  %v77_v44 = vld [vmem:[%s676_s1 + $0xf8] sm:$0xff]  ;;  %v60_v47 = vld [vmem:[%s676_s1 + $0x70] sm:$0xff] }
   0xc   :  { %v373_v45 = vpack.c.bf16 %v59_v42, %v58_v41  ;;  %v375_v46 = vpack.c.bf16 %v77_v44, %v76_v43  ;;  %v61_v48 = vld [vmem:[%s676_s1 + $0x78] sm:$0xff]  ;;  %v14_v50 = vld [vmem:[%s677_s0] sm:$0xff]  ;;  %v16_v54 = vld [vmem:[%s677_s0 + $0x10] sm:$0xff] }
   0xd   :  { %358 = vmatpush3.bf16.msra.mxu0 %v357_v19  ;;  %389 = vmatpush3.bf16.msra.mxu1 %v357_v19  ;;  %v377_v49 = vpack.c.bf16 %v61_v48, %v60_v47  ;;  %v30_v51 = vld [vmem:[%s677_s0 + $0x80] sm:$0xff]  ;;  %v17_v52 = vld [vmem:[%s677_s0 + $0x18] sm:$0xff]  ;;  %v32_v55 = vld [vmem:[%s677_s0 + $0x90] sm:$0xff] }
   0xe   :  { %360 = vmatprep.subr.bf16.mxu0 %v359_v20  ;;  %382 = vmatprep.subr.bf16.mxu1 %v359_v20  ;;  %v33_v53 = vld [vmem:[%s677_s0 + $0x98] sm:$0xff]  ;;  %v19_v56 = vld [vmem:[%s677_s0 + $0x28] sm:$0xff]  ;;  %v18_v58 = vld [vmem:[%s677_s0 + $0x20] sm:$0xff] }
   0xf   :  { %v35_v57 = vld [vmem:[%s677_s0 + $0xa8] sm:$0xff]  ;;  %v34_v59 = vld [vmem:[%s677_s0 + $0xa0] sm:$0xff]  ;;  %v21_v60 = vld [vmem:[%s677_s0 + $0x38] sm:$0xff] }
  0x10   :  { %v37_v61 = vld [vmem:[%s677_s0 + $0xb8] sm:$0xff]  ;;  %v20_v62 = vld [vmem:[%s677_s0 + $0x30] sm:$0xff]  ;;  %v23_v0 = vld [vmem:[%s677_s0 + $0x48] sm:$0xff] }
  0x11   :  { %362 = vmatpush3.bf16.msra.mxu0 %v361_v27  ;;  %390 = vmatpush3.bf16.msra.mxu1 %v361_v27  ;;  %v36_v63 = vld [vmem:[%s677_s0 + $0xb0] sm:$0xff]  ;;  %v39_v1 = vld [vmem:[%s677_s0 + $0xc8] sm:$0xff]  ;;  %v22_v2 = vld [vmem:[%s677_s0 + $0x40] sm:$0xff] }
  0x12   :  { %364 = vmatprep.subr.bf16.mxu0 %v363_v28  ;;  %383 = vmatprep.subr.bf16.mxu1 %v363_v28  ;;  %v38_v3 = vld [vmem:[%s677_s0 + $0xc0] sm:$0xff]  ;;  %v25_v4 = vld [vmem:[%s677_s0 + $0x58] sm:$0xff]  ;;  %v24_v6 = vld [vmem:[%s677_s0 + $0x50] sm:$0xff] }
  0x13   :  { %v41_v5 = vld [vmem:[%s677_s0 + $0xd8] sm:$0xff]  ;;  %v40_v7 = vld [vmem:[%s677_s0 + $0xd0] sm:$0xff]  ;;  %v27_v8 = vld [vmem:[%s677_s0 + $0x68] sm:$0xff] }
  0x14   :  { %v43_v9 = vld [vmem:[%s677_s0 + $0xe8] sm:$0xff]  ;;  %v26_v10 = vld [vmem:[%s677_s0 + $0x60] sm:$0xff]  ;;  %v29_v12 = vld [vmem:[%s677_s0 + $0x78] sm:$0xff] }
  0x15   :  { %366 = vmatpush3.bf16.msra.mxu0 %v365_v33  ;;  %391 = vmatpush3.bf16.msra.mxu1 %v365_v33  ;;  %v42_v11 = vld [vmem:[%s677_s0 + $0xe0] sm:$0xff]  ;;  %v45_v13 = vld [vmem:[%s677_s0 + $0xf8] sm:$0xff]  ;;  %v28_v14 = vld [vmem:[%s677_s0 + $0x70] sm:$0xff] }
  0x16   :  { %368 = vmatprep.subr.bf16.mxu0 %v367_v34  ;;  %384 = vmatprep.subr.bf16.mxu1 %v367_v34  ;;  %v44_v15 = vld [vmem:[%s677_s0 + $0xf0] sm:$0xff]  ;;  %v610_v18 = vld [vmem:[%s678_s2] ss:$0 sm:$0xff] }
  0x19   :  { %370 = vmatpush3.bf16.msra.mxu0 %v369_v39  ;;  %392 = vmatpush3.bf16.msra.mxu1 %v369_v39 }
  0x1a   :  { %372 = vmatprep.subr.bf16.mxu0 %v371_v40  ;;  %385 = vmatprep.subr.bf16.mxu1 %v371_v40 }
  0x1d   :  { %374 = vmatpush3.bf16.msra.mxu0 %v373_v45  ;;  %393 = vmatpush3.bf16.msra.mxu1 %v373_v45 }
  0x1e   :  { %376 = vmatprep.subr.bf16.mxu0 %v375_v46  ;;  %386 = vmatprep.subr.bf16.mxu1 %v375_v46 }
  0x21   :  { %378 = vmatpush3.bf16.msra.mxu0 %v377_v49  ;;  %394 = vmatpush3.bf16.msra.mxu1 %v377_v49 }
  0x24   :  { %150 = vmatmul.mubr.f32.vlgmr.msra.gmra.mrb[0].mxu0 %v14_v50  ;;  %190 = vmatmul.mubr.f32.vlgmr.msra.gmra.mrb[0].mxu1 %v30_v51 }
  0x25   :  { %154 = vmatprep.mubr.f32.mxu0 %v17_v52  ;;  %194 = vmatprep.mubr.f32.mxu1 %v33_v53 }
  0x28   :  { %155 = vmatmul.mubr.f32.gmra.mrb[2].mxu0 %v16_v54  ;;  %195 = vmatmul.mubr.f32.gmra.mrb[2].mxu1 %v32_v55 }
  0x29   :  { %159 = vmatprep.mubr.f32.mxu0 %v19_v56  ;;  %199 = vmatprep.mubr.f32.mxu1 %v35_v57 }
  0x2c   :  { %160 = vmatmul.mubr.f32.gmra.mrb[4].mxu0 %v18_v58  ;;  %200 = vmatmul.mubr.f32.gmra.mrb[4].mxu1 %v34_v59 }
  0x2d   :  { %164 = vmatprep.mubr.f32.mxu0 %v21_v60  ;;  %204 = vmatprep.mubr.f32.mxu1 %v37_v61 }
  0x30   :  { %165 = vmatmul.mubr.f32.gmra.mrb[6].mxu0 %v20_v62  ;;  %205 = vmatmul.mubr.f32.gmra.mrb[6].mxu1 %v36_v63 }
  0x31   :  { %169 = vmatprep.mubr.f32.mxu0 %v23_v0  ;;  %209 = vmatprep.mubr.f32.mxu1 %v39_v1 }
  0x34   :  { %170 = vmatmul.mubr.f32.gmra.mrb[8].mxu0 %v22_v2  ;;  %210 = vmatmul.mubr.f32.gmra.mrb[8].mxu1 %v38_v3 }
  0x35   :  { %174 = vmatprep.mubr.f32.mxu0 %v25_v4  ;;  %214 = vmatprep.mubr.f32.mxu1 %v41_v5 }
  0x38   :  { %175 = vmatmul.mubr.f32.gmra.mrb[10].mxu0 %v24_v6  ;;  %215 = vmatmul.mubr.f32.gmra.mrb[10].mxu1 %v40_v7 }
  0x39   :  { %179 = vmatprep.mubr.f32.mxu0 %v27_v8  ;;  %219 = vmatprep.mubr.f32.mxu1 %v43_v9 }
  0x3c   :  { %180 = vmatmul.mubr.f32.gmra.mrb[12].mxu0 %v26_v10  ;;  %220 = vmatmul.mubr.f32.gmra.mrb[12].mxu1 %v42_v11 }
  0x3d   :  { %184 = vmatprep.mubr.f32.mxu0 %v29_v12  ;;  %224 = vmatprep.mubr.f32.mxu1 %v45_v13 }
  0x40   :  { %185 = vmatmul.mubr.f32.gmra.mrb[14].mxu0 %v28_v14  ;;  %225 = vmatmul.mubr.f32.gmra.mrb[14].mxu1 %v44_v15 }
  0xf7   :  { %v299_v16 = vpop.f32.mrb[0].mxu0  ;;  %v323_v17 = vpop.f32.mrb[0].mxu1 }
  0xf8   :  { %v300_v19 = vpop.f32.mrb[1].mxu0  ;;  %v324_v20 = vpop.f32.mrb[1].mxu1 }
  0xf9   :  { %v301_v21 = vadd.f32 %v300_v19, %v299_v16  ;;  %v325_v22 = vadd.f32 %v324_v20, %v323_v17 }
  0xfb   :  { %v152_v23 = vadd.f32 %v301_v21, %v610_v18  ;;  %v192_v24 = vadd.f32 %v325_v22, %v610_v18  ;;  %v302_v25 = vpop.f32.mrb[2].mxu0  ;;  %v326_v26 = vpop.f32.mrb[2].mxu1 }
  0xfc   :  { %v303_v27 = vpop.f32.mrb[3].mxu0  ;;  %v327_v28 = vpop.f32.mrb[3].mxu1 }
  0xfd   :  { %v230_v29 = vmax.f32 %v152_v23, 0.0  ;;  %v238_v30 = vmax.f32 %v192_v24, 0.0  ;;  %v304_v31 = vadd.f32 %v303_v27, %v302_v25  ;;  %v328_v32 = vadd.f32 %v327_v28, %v326_v26 }
  0xff   :  { %246 = vst [vmem:[%s679_s3] sm:$0xff] %v230_v29  ;;  %254 = vst [vmem:[%s679_s3 + $0x40] sm:$0xff] %v238_v30  ;;  %v157_v33 = vadd.f32 %v304_v31, %v610_v18  ;;  %v197_v34 = vadd.f32 %v328_v32, %v610_v18  ;;  %v305_v35 = vpop.f32.mrb[4].mxu0  ;;  %v329_v36 = vpop.f32.mrb[4].mxu1 }
 0x100   :  { %v306_v37 = vpop.f32.mrb[5].mxu0  ;;  %v330_v38 = vpop.f32.mrb[5].mxu1 }
 0x101   :  { %v231_v39 = vmax.f32 %v157_v33, 0.0  ;;  %v239_v40 = vmax.f32 %v197_v34, 0.0  ;;  %v307_v41 = vadd.f32 %v306_v37, %v305_v35  ;;  %v331_v42 = vadd.f32 %v330_v38, %v329_v36 }
 0x103   :  { %247 = vst [vmem:[%s679_s3 + $0x8] sm:$0xff] %v231_v39  ;;  %255 = vst [vmem:[%s679_s3 + $0x48] sm:$0xff] %v239_v40  ;;  %v162_v43 = vadd.f32 %v307_v41, %v610_v18  ;;  %v202_v44 = vadd.f32 %v331_v42, %v610_v18  ;;  %v308_v45 = vpop.f32.mrb[6].mxu0  ;;  %v332_v46 = vpop.f32.mrb[6].mxu1 }
 0x104   :  { %v309_v47 = vpop.f32.mrb[7].mxu0  ;;  %v333_v48 = vpop.f32.mrb[7].mxu1 }
 0x105   :  { %v232_v49 = vmax.f32 %v162_v43, 0.0  ;;  %v240_v50 = vmax.f32 %v202_v44, 0.0  ;;  %v310_v51 = vadd.f32 %v309_v47, %v308_v45  ;;  %v334_v52 = vadd.f32 %v333_v48, %v332_v46 }
 0x107   :  { %248 = vst [vmem:[%s679_s3 + $0x10] sm:$0xff] %v232_v49  ;;  %256 = vst [vmem:[%s679_s3 + $0x50] sm:$0xff] %v240_v50  ;;  %v167_v53 = vadd.f32 %v310_v51, %v610_v18  ;;  %v207_v54 = vadd.f32 %v334_v52, %v610_v18  ;;  %v311_v55 = vpop.f32.mrb[8].mxu0  ;;  %v335_v56 = vpop.f32.mrb[8].mxu1 }
 0x108   :  { %v312_v57 = vpop.f32.mrb[9].mxu0  ;;  %v336_v58 = vpop.f32.mrb[9].mxu1 }
 0x109   :  { %v233_v59 = vmax.f32 %v167_v53, 0.0  ;;  %v241_v60 = vmax.f32 %v207_v54, 0.0  ;;  %v313_v61 = vadd.f32 %v312_v57, %v311_v55  ;;  %v337_v62 = vadd.f32 %v336_v58, %v335_v56 }
 0x10b   :  { %249 = vst [vmem:[%s679_s3 + $0x18] sm:$0xff] %v233_v59  ;;  %257 = vst [vmem:[%s679_s3 + $0x58] sm:$0xff] %v241_v60  ;;  %v172_v63 = vadd.f32 %v313_v61, %v610_v18  ;;  %v212_v0 = vadd.f32 %v337_v62, %v610_v18  ;;  %v314_v1 = vpop.f32.mrb[10].mxu0  ;;  %v338_v2 = vpop.f32.mrb[10].mxu1 }
 0x10c   :  { %v315_v3 = vpop.f32.mrb[11].mxu0  ;;  %v339_v4 = vpop.f32.mrb[11].mxu1 }
 0x10d   :  { %v234_v5 = vmax.f32 %v172_v63, 0.0  ;;  %v242_v6 = vmax.f32 %v212_v0, 0.0  ;;  %v316_v7 = vadd.f32 %v315_v3, %v314_v1  ;;  %v340_v8 = vadd.f32 %v339_v4, %v338_v2 }
 0x10f   :  { %250 = vst [vmem:[%s679_s3 + $0x20] sm:$0xff] %v234_v5  ;;  %258 = vst [vmem:[%s679_s3 + $0x60] sm:$0xff] %v242_v6  ;;  %v177_v9 = vadd.f32 %v316_v7, %v610_v18  ;;  %v217_v10 = vadd.f32 %v340_v8, %v610_v18  ;;  %v317_v11 = vpop.f32.mrb[12].mxu0  ;;  %v341_v12 = vpop.f32.mrb[12].mxu1 }
 0x110   :  { %v318_v13 = vpop.f32.mrb[13].mxu0  ;;  %v342_v14 = vpop.f32.mrb[13].mxu1 }
 0x111   :  { %v235_v15 = vmax.f32 %v177_v9, 0.0  ;;  %v243_v16 = vmax.f32 %v217_v10, 0.0  ;;  %v319_v17 = vadd.f32 %v318_v13, %v317_v11  ;;  %v343_v19 = vadd.f32 %v342_v14, %v341_v12 }
 0x113   :  { %251 = vst [vmem:[%s679_s3 + $0x28] sm:$0xff] %v235_v15  ;;  %259 = vst [vmem:[%s679_s3 + $0x68] sm:$0xff] %v243_v16  ;;  %v182_v20 = vadd.f32 %v319_v17, %v610_v18  ;;  %v222_v21 = vadd.f32 %v343_v19, %v610_v18  ;;  %v320_v22 = vpop.f32.mrb[14].mxu0  ;;  %v344_v23 = vpop.f32.mrb[14].mxu1 }
 0x114   :  { %v321_v24 = vpop.f32.mrb[15].mxu0  ;;  %v345_v25 = vpop.f32.mrb[15].mxu1 }
 0x115   :  { %v236_v26 = vmax.f32 %v182_v20, 0.0  ;;  %v244_v27 = vmax.f32 %v222_v21, 0.0  ;;  %v322_v28 = vadd.f32 %v321_v24, %v320_v22  ;;  %v346_v29 = vadd.f32 %v345_v25, %v344_v23 }
 0x117   :  { %252 = vst [vmem:[%s679_s3 + $0x30] sm:$0xff] %v236_v26  ;;  %260 = vst [vmem:[%s679_s3 + $0x70] sm:$0xff] %v244_v27  ;;  %v187_v30 = vadd.f32 %v322_v28, %v610_v18  ;;  %v227_v31 = vadd.f32 %v346_v29, %v610_v18 }
 0x119   :  { %v237_v32 = vmax.f32 %v187_v30, 0.0  ;;  %v245_v33 = vmax.f32 %v227_v31, 0.0 }
 0x11b   :  { %253 = vst [vmem:[%s679_s3 + $0x38] sm:$0xff] %v237_v32  ;;  %261 = vst [vmem:[%s679_s3 + $0x78] sm:$0xff] %v245_v33 }

// kernel: actor_forward.4
= control target key start
LH: loop header
LB: loop body
LE: loop exit
PB: predicated region body
PF: predicated region fallthrough
CT: control target
= control target key end

     0   :  { %s2504_s1 = inlined_call_operand.vmem [shape: f32[2048,128], index: 1, kind: input, shape index: {}]   ;;  %s2505_s0 = inlined_call_operand.vmem [shape: f32[24,2048], index: 0, kind: input, shape index: {}]   ;;  %s2506_s2 = inlined_call_operand.vmem [shape: f32[1,128], index: 2, kind: input, shape index: {}]   ;;  %s2507_s3 = inlined_call_operand.vmem [shape: f32[24,128], index: 3, kind: output, shape index: {}]  }
   0x1   :  { %v78_v0 = vld [vmem:[%s2504_s1 + $0x80] sm:$0xff]  ;;  %v79_v1 = vld [vmem:[%s2504_s1 + $0x88] sm:$0xff]  ;;  %v80_v11 = vld [vmem:[%s2504_s1 + $0x90] sm:$0xff] }
   0x2   :  { %v62_v2 = vld [vmem:[%s2504_s1] sm:$0xff]  ;;  %v1304_v3 = vpack.c.bf16 %v79_v1, %v78_v0  ;;  %v63_v4 = vld [vmem:[%s2504_s1 + $0x8] sm:$0xff]  ;;  %v81_v13 = vld [vmem:[%s2504_s1 + $0x98] sm:$0xff] }
   0x3   :  { %v110_v5 = vld [vmem:[%s2504_s1 + $0x180] sm:$0xff]  ;;  %v111_v6 = vld [vmem:[%s2504_s1 + $0x188] sm:$0xff]  ;;  %v1306_v7 = vpack.c.bf16 %v63_v4, %v62_v2  ;;  %v64_v14 = vld [vmem:[%s2504_s1 + $0x10] sm:$0xff]  ;;  %v1308_v16 = vpack.c.bf16 %v81_v13, %v80_v11 }
   0x4   :  { %v1336_v8 = vpack.c.bf16 %v111_v6, %v110_v5  ;;  %v94_v9 = vld [vmem:[%s2504_s1 + $0x100] sm:$0xff]  ;;  %v95_v10 = vld [vmem:[%s2504_s1 + $0x108] sm:$0xff]  ;;  %1305 = vmatprep.subr.bf16.mxu0 %v1304_v3  ;;  %v65_v15 = vld [vmem:[%s2504_s1 + $0x18] sm:$0xff] }
   0x5   :  { %v1338_v12 = vpack.c.bf16 %v95_v10, %v94_v9  ;;  %1307 = vmatpush3.bf16.msra.mxu0 %v1306_v7  ;;  %v1310_v17 = vpack.c.bf16 %v65_v15, %v64_v14  ;;  %v112_v18 = vld [vmem:[%s2504_s1 + $0x190] sm:$0xff]  ;;  %v113_v19 = vld [vmem:[%s2504_s1 + $0x198] sm:$0xff]  ;;  %v82_v23 = vld [vmem:[%s2504_s1 + $0xa0] sm:$0xff] }
   0x6   :  { %1337 = vmatprep.subr.bf16.mxu1 %v1336_v8  ;;  %v96_v20 = vld [vmem:[%s2504_s1 + $0x110] sm:$0xff]  ;;  %v1340_v21 = vpack.c.bf16 %v113_v19, %v112_v18  ;;  %v97_v22 = vld [vmem:[%s2504_s1 + $0x118] sm:$0xff]  ;;  %v83_v24 = vld [vmem:[%s2504_s1 + $0xa8] sm:$0xff]  ;;  %1309 = vmatprep.subr.bf16.mxu0 %v1308_v16 }
   0x7   :  { %1339 = vmatpush3.bf16.msra.mxu1 %v1338_v12  ;;  %v1342_v25 = vpack.c.bf16 %v97_v22, %v96_v20  ;;  %v1312_v26 = vpack.c.bf16 %v83_v24, %v82_v23  ;;  %v66_v27 = vld [vmem:[%s2504_s1 + $0x20] sm:$0xff]  ;;  %v67_v28 = vld [vmem:[%s2504_s1 + $0x28] sm:$0xff]  ;;  %v84_v35 = vld [vmem:[%s2504_s1 + $0xb0] sm:$0xff] }
   0x8   :  { %v114_v29 = vld [vmem:[%s2504_s1 + $0x1a0] sm:$0xff]  ;;  %1341 = vmatprep.subr.bf16.mxu1 %v1340_v21  ;;  %v115_v30 = vld [vmem:[%s2504_s1 + $0x1a8] sm:$0xff]  ;;  %v1314_v33 = vpack.c.bf16 %v67_v28, %v66_v27  ;;  %v85_v36 = vld [vmem:[%s2504_s1 + $0xb8] sm:$0xff] }
   0x9   :  { %v98_v31 = vld [vmem:[%s2504_s1 + $0x120] sm:$0xff]  ;;  %v99_v32 = vld [vmem:[%s2504_s1 + $0x128] sm:$0xff]  ;;  %1311 = vmatpush3.bf16.msra.mxu0 %v1310_v17  ;;  %v1344_v34 = vpack.c.bf16 %v115_v30, %v114_v29  ;;  %v68_v37 = vld [vmem:[%s2504_s1 + $0x30] sm:$0xff]  ;;  %v1316_v39 = vpack.c.bf16 %v85_v36, %v84_v35 }
   0xa   :  { %1313 = vmatprep.subr.bf16.mxu0 %v1312_v26  ;;  %v1346_v38 = vpack.c.bf16 %v99_v32, %v98_v31  ;;  %v69_v40 = vld [vmem:[%s2504_s1 + $0x38] sm:$0xff]  ;;  %v116_v41 = vld [vmem:[%s2504_s1 + $0x1b0] sm:$0xff]  ;;  %v86_v46 = vld [vmem:[%s2504_s1 + $0xc0] sm:$0xff] }
   0xb   :  { %1343 = vmatpush3.bf16.msra.mxu1 %v1342_v25  ;;  %v117_v42 = vld [vmem:[%s2504_s1 + $0x1b8] sm:$0xff]  ;;  %v100_v44 = vld [vmem:[%s2504_s1 + $0x130] sm:$0xff]  ;;  %v87_v47 = vld [vmem:[%s2504_s1 + $0xc8] sm:$0xff]  ;;  %v1318_v48 = vpack.c.bf16 %v69_v40, %v68_v37 }
   0xc   :  { %1345 = vmatprep.subr.bf16.mxu1 %v1344_v34  ;;  %v1348_v43 = vpack.c.bf16 %v117_v42, %v116_v41  ;;  %v101_v45 = vld [vmem:[%s2504_s1 + $0x138] sm:$0xff]  ;;  %v118_v49 = vld [vmem:[%s2504_s1 + $0x1c0] sm:$0xff]  ;;  %v119_v50 = vld [vmem:[%s2504_s1 + $0x1c8] sm:$0xff]  ;;  %v1320_v52 = vpack.c.bf16 %v87_v47, %v86_v46 }
   0xd   :  { %1315 = vmatpush3.bf16.msra.mxu0 %v1314_v33  ;;  %v1350_v51 = vpack.c.bf16 %v101_v45, %v100_v44  ;;  %v70_v53 = vld [vmem:[%s2504_s1 + $0x40] sm:$0xff]  ;;  %v71_v54 = vld [vmem:[%s2504_s1 + $0x48] sm:$0xff]  ;;  %v1352_v56 = vpack.c.bf16 %v119_v50, %v118_v49  ;;  %v88_v58 = vld [vmem:[%s2504_s1 + $0xd0] sm:$0xff] }
   0xe   :  { %1317 = vmatprep.subr.bf16.mxu0 %v1316_v39  ;;  %v102_v55 = vld [vmem:[%s2504_s1 + $0x140] sm:$0xff]  ;;  %v103_v57 = vld [vmem:[%s2504_s1 + $0x148] sm:$0xff]  ;;  %v89_v59 = vld [vmem:[%s2504_s1 + $0xd8] sm:$0xff]  ;;  %v1322_v62 = vpack.c.bf16 %v71_v54, %v70_v53 }
   0xf   :  { %1347 = vmatpush3.bf16.msra.mxu1 %v1346_v38  ;;  %v120_v60 = vld [vmem:[%s2504_s1 + $0x1d0] sm:$0xff]  ;;  %v121_v61 = vld [vmem:[%s2504_s1 + $0x1d8] sm:$0xff]  ;;  %v1354_v63 = vpack.c.bf16 %v103_v57, %v102_v55  ;;  %v1324_v0 = vpack.c.bf16 %v89_v59, %v88_v58  ;;  %v90_v6 = vld [vmem:[%s2504_s1 + $0xe0] sm:$0xff] }
  0x10   :  { %1349 = vmatprep.subr.bf16.mxu1 %v1348_v43  ;;  %v72_v1 = vld [vmem:[%s2504_s1 + $0x50] sm:$0xff]  ;;  %v73_v2 = vld [vmem:[%s2504_s1 + $0x58] sm:$0xff]  ;;  %v1356_v4 = vpack.c.bf16 %v121_v61, %v120_v60  ;;  %v91_v7 = vld [vmem:[%s2504_s1 + $0xe8] sm:$0xff] }
  0x11   :  { %1319 = vmatpush3.bf16.msra.mxu0 %v1318_v48  ;;  %v104_v3 = vld [vmem:[%s2504_s1 + $0x150] sm:$0xff]  ;;  %v105_v5 = vld [vmem:[%s2504_s1 + $0x158] sm:$0xff]  ;;  %v122_v8 = vld [vmem:[%s2504_s1 + $0x1e0] sm:$0xff]  ;;  %v1326_v10 = vpack.c.bf16 %v73_v2, %v72_v1  ;;  %v1328_v14 = vpack.c.bf16 %v91_v7, %v90_v6 }
  0x12   :  { %1321 = vmatprep.subr.bf16.mxu0 %v1320_v52  ;;  %v123_v9 = vld [vmem:[%s2504_s1 + $0x1e8] sm:$0xff]  ;;  %v74_v11 = vld [vmem:[%s2504_s1 + $0x60] sm:$0xff]  ;;  %v1358_v13 = vpack.c.bf16 %v105_v5, %v104_v3  ;;  %v92_v19 = vld [vmem:[%s2504_s1 + $0xf0] sm:$0xff] }
  0x13   :  { %1351 = vmatpush3.bf16.msra.mxu1 %v1350_v51  ;;  %v75_v12 = vld [vmem:[%s2504_s1 + $0x68] sm:$0xff]  ;;  %v106_v15 = vld [vmem:[%s2504_s1 + $0x160] sm:$0xff]  ;;  %v1360_v18 = vpack.c.bf16 %v123_v9, %v122_v8  ;;  %v93_v20 = vld [vmem:[%s2504_s1 + $0xf8] sm:$0xff] }
  0x14   :  { %1353 = vmatprep.subr.bf16.mxu1 %v1352_v56  ;;  %v107_v16 = vld [vmem:[%s2504_s1 + $0x168] sm:$0xff]  ;;  %v17_v21 = vld [vmem:[%s2505_s0 + $0x18] sm:$0xff]  ;;  %v124_v22 = vld [vmem:[%s2504_s1 + $0x1f0] sm:$0xff]  ;;  %v1330_v24 = vpack.c.bf16 %v75_v12, %v74_v11  ;;  %v1332_v26 = vpack.c.bf16 %v93_v20, %v92_v19 }
  0x15   :  { %1323 = vmatpush3.bf16.msra.mxu0 %v1322_v62  ;;  %v15_v17 = vld [vmem:[%s2505_s0 + $0x8] sm:$0xff]  ;;  %v125_v23 = vld [vmem:[%s2504_s1 + $0x1f8] sm:$0xff]  ;;  %469 = vmatprep.mubr.f32.mxu1 %v17_v21  ;;  %v1362_v25 = vpack.c.bf16 %v107_v16, %v106_v15  ;;  %v76_v27 = vld [vmem:[%s2504_s1 + $0x70] sm:$0xff] }
  0x16   :  { %1325 = vmatprep.subr.bf16.mxu0 %v1324_v0  ;;  %389 = vmatprep.mubr.f32.mxu0 %v15_v17  ;;  %v77_v28 = vld [vmem:[%s2504_s1 + $0x78] sm:$0xff]  ;;  %v108_v29 = vld [vmem:[%s2504_s1 + $0x170] sm:$0xff]  ;;  %v1364_v30 = vpack.c.bf16 %v125_v23, %v124_v22  ;;  %v142_v32 = vld [vmem:[%s2504_s1 + $0x280] sm:$0xff] }
  0x17   :  { %1355 = vmatpush3.bf16.msra.mxu1 %v1354_v63  ;;  %v109_v31 = vld [vmem:[%s2504_s1 + $0x178] sm:$0xff]  ;;  %v143_v33 = vld [vmem:[%s2504_s1 + $0x288] sm:$0xff]  ;;  %v174_v34 = vld [vmem:[%s2504_s1 + $0x380] sm:$0xff]  ;;  %v1334_v36 = vpack.c.bf16 %v77_v28, %v76_v27 }
  0x18   :  { %1357 = vmatprep.subr.bf16.mxu1 %v1356_v4  ;;  %v175_v35 = vld [vmem:[%s2504_s1 + $0x388] sm:$0xff]  ;;  %v1366_v37 = vpack.c.bf16 %v109_v31, %v108_v29  ;;  %v1368_v38 = vpack.c.bf16 %v143_v33, %v142_v32  ;;  %v126_v39 = vld [vmem:[%s2504_s1 + $0x200] sm:$0xff]  ;;  %v144_v44 = vld [vmem:[%s2504_s1 + $0x290] sm:$0xff] }
  0x19   :  { %1327 = vmatpush3.bf16.msra.mxu0 %v1326_v10  ;;  %v127_v40 = vld [vmem:[%s2504_s1 + $0x208] sm:$0xff]  ;;  %v158_v41 = vld [vmem:[%s2504_s1 + $0x300] sm:$0xff]  ;;  %v1400_v42 = vpack.c.bf16 %v175_v35, %v174_v34  ;;  %v145_v45 = vld [vmem:[%s2504_s1 + $0x298] sm:$0xff] }
  0x1a   :  { %1329 = vmatprep.subr.bf16.mxu0 %v1328_v14  ;;  %v159_v43 = vld [vmem:[%s2504_s1 + $0x308] sm:$0xff]  ;;  %v176_v46 = vld [vmem:[%s2504_s1 + $0x390] sm:$0xff]  ;;  %v177_v47 = vld [vmem:[%s2504_s1 + $0x398] sm:$0xff]  ;;  %v1370_v49 = vpack.c.bf16 %v127_v40, %v126_v39  ;;  %v1372_v52 = vpack.c.bf16 %v145_v45, %v144_v44 }
  0x1b   :  { %1359 = vmatpush3.bf16.msra.mxu1 %v1358_v13  ;;  %v14_v48 = vld [vmem:[%s2505_s0] sm:$0xff]  ;;  %v16_v50 = vld [vmem:[%s2505_s0 + $0x10] sm:$0xff]  ;;  %v1402_v51 = vpack.c.bf16 %v159_v43, %v158_v41  ;;  %v129_v54 = vld [vmem:[%s2504_s1 + $0x218] sm:$0xff]  ;;  %v1404_v56 = vpack.c.bf16 %v177_v47, %v176_v46 }
  0x1c   :  { %1361 = vmatprep.subr.bf16.mxu1 %v1360_v18  ;;  %v128_v53 = vld [vmem:[%s2504_s1 + $0x210] sm:$0xff]  ;;  %v161_v57 = vld [vmem:[%s2504_s1 + $0x318] sm:$0xff]  ;;  %v146_v58 = vld [vmem:[%s2504_s1 + $0x2a0] sm:$0xff] }
  0x1d   :  { %1331 = vmatpush3.bf16.msra.mxu0 %v1330_v24  ;;  %v160_v55 = vld [vmem:[%s2504_s1 + $0x310] sm:$0xff]  ;;  %v147_v59 = vld [vmem:[%s2504_s1 + $0x2a8] sm:$0xff]  ;;  %v178_v60 = vld [vmem:[%s2504_s1 + $0x3a0] sm:$0xff]  ;;  %v1374_v62 = vpack.c.bf16 %v129_v54, %v128_v53 }
  0x1e   :  { %1333 = vmatprep.subr.bf16.mxu0 %v1332_v26  ;;  %v179_v61 = vld [vmem:[%s2504_s1 + $0x3a8] sm:$0xff]  ;;  %v130_v63 = vld [vmem:[%s2504_s1 + $0x220] sm:$0xff]  ;;  %v1406_v0 = vpack.c.bf16 %v161_v57, %v160_v55  ;;  %v1376_v1 = vpack.c.bf16 %v147_v59, %v146_v58  ;;  %v148_v6 = vld [vmem:[%s2504_s1 + $0x2b0] sm:$0xff] }
  0x1f   :  { %1363 = vmatpush3.bf16.msra.mxu1 %v1362_v25  ;;  %v131_v2 = vld [vmem:[%s2504_s1 + $0x228] sm:$0xff]  ;;  %v162_v3 = vld [vmem:[%s2504_s1 + $0x320] sm:$0xff]  ;;  %v1408_v5 = vpack.c.bf16 %v179_v61, %v178_v60  ;;  %v149_v7 = vld [vmem:[%s2504_s1 + $0x2b8] sm:$0xff] }
  0x20   :  { %1365 = vmatprep.subr.bf16.mxu1 %v1364_v30  ;;  %v163_v4 = vld [vmem:[%s2504_s1 + $0x328] sm:$0xff]  ;;  %v180_v9 = vld [vmem:[%s2504_s1 + $0x3b0] sm:$0xff]  ;;  %v181_v10 = vld [vmem:[%s2504_s1 + $0x3b8] sm:$0xff]  ;;  %v1378_v12 = vpack.c.bf16 %v131_v2, %v130_v63  ;;  %v1380_v17 = vpack.c.bf16 %v149_v7, %v148_v6 }
  0x21   :  { %1335 = vmatpush3.bf16.msra.mxu0 %v1334_v36  ;;  %v31_v8 = vld [vmem:[%s2505_s0 + $0x88] sm:$0xff]  ;;  %v30_v11 = vld [vmem:[%s2505_s0 + $0x80] sm:$0xff]  ;;  %v132_v13 = vld [vmem:[%s2504_s1 + $0x230] sm:$0xff]  ;;  %v1410_v16 = vpack.c.bf16 %v163_v4, %v162_v3  ;;  %v1412_v21 = vpack.c.bf16 %v181_v10, %v180_v9 }
  0x22   :  { %1369 = vmatprep.subr.bf16.mxu0 %v1368_v38  ;;  %v133_v14 = vld [vmem:[%s2504_s1 + $0x238] sm:$0xff]  ;;  %v164_v18 = vld [vmem:[%s2504_s1 + $0x330] sm:$0xff]  ;;  %v150_v22 = vld [vmem:[%s2504_s1 + $0x2c0] sm:$0xff] }
  0x23   :  { %1367 = vmatpush3.bf16.msra.mxu1 %v1366_v37  ;;  %v33_v15 = vld [vmem:[%s2505_s0 + $0x98] sm:$0xff]  ;;  %v32_v20 = vld [vmem:[%s2505_s0 + $0x90] sm:$0xff]  ;;  %v151_v23 = vld [vmem:[%s2504_s1 + $0x2c8] sm:$0xff]  ;;  %v1382_v28 = vpack.c.bf16 %v133_v14, %v132_v13 }
  0x24   :  { %1401 = vmatprep.subr.bf16.mxu1 %v1400_v42  ;;  %390 = vmatmul.mubr.f32.vlgmr.msra.gmra.mrb[0].mxu0 %v14_v48  ;;  %v165_v19 = vld [vmem:[%s2504_s1 + $0x338] sm:$0xff]  ;;  %v47_v24 = vld [vmem:[%s2505_s0 + $0x108] sm:$0xff]  ;;  %v182_v25 = vld [vmem:[%s2504_s1 + $0x3c0] sm:$0xff]  ;;  %v1384_v33 = vpack.c.bf16 %v151_v23, %v150_v22 }
  0x25   :  { %1371 = vmatpush3.bf16.msra.mxu0 %v1370_v49  ;;  %394 = vmatprep.mubr.f32.mxu0 %v31_v8  ;;  %v183_v26 = vld [vmem:[%s2504_s1 + $0x3c8] sm:$0xff]  ;;  %v46_v27 = vld [vmem:[%s2505_s0 + $0x100] sm:$0xff]  ;;  %v49_v31 = vld [vmem:[%s2505_s0 + $0x118] sm:$0xff]  ;;  %v1414_v32 = vpack.c.bf16 %v165_v19, %v164_v18 }
  0x26   :  { %470 = vmatmul.mubr.f32.vlgmr.msra.gmra.mrb[0].mxu1 %v16_v50  ;;  %1373 = vmatprep.subr.bf16.mxu0 %v1372_v52  ;;  %v134_v29 = vld [vmem:[%s2504_s1 + $0x240] sm:$0xff]  ;;  %v135_v30 = vld [vmem:[%s2504_s1 + $0x248] sm:$0xff]  ;;  %v48_v36 = vld [vmem:[%s2505_s0 + $0x110] sm:$0xff]  ;;  %v1416_v37 = vpack.c.bf16 %v183_v26, %v182_v25 }
  0x27   :  { %1403 = vmatpush3.bf16.msra.mxu1 %v1402_v51  ;;  %474 = vmatprep.mubr.f32.mxu1 %v33_v15  ;;  %v166_v34 = vld [vmem:[%s2504_s1 + $0x340] sm:$0xff]  ;;  %v167_v35 = vld [vmem:[%s2504_s1 + $0x348] sm:$0xff]  ;;  %v152_v38 = vld [vmem:[%s2504_s1 + $0x2d0] sm:$0xff]  ;;  %v1386_v43 = vpack.c.bf16 %v135_v30, %v134_v29 }
  0x28   :  { %1405 = vmatprep.subr.bf16.mxu1 %v1404_v56  ;;  %395 = vmatmul.mubr.f32.gmra.mrb[2].mxu0 %v30_v11  ;;  %v153_v39 = vld [vmem:[%s2504_s1 + $0x2d8] sm:$0xff]  ;;  %v19_v40 = vld [vmem:[%s2505_s0 + $0x28] sm:$0xff]  ;;  %v184_v41 = vld [vmem:[%s2504_s1 + $0x3d0] sm:$0xff]  ;;  %v1418_v45 = vpack.c.bf16 %v167_v35, %v166_v34 }
  0x29   :  { %1375 = vmatpush3.bf16.msra.mxu0 %v1374_v62  ;;  %399 = vmatprep.mubr.f32.mxu0 %v47_v24  ;;  %v185_v42 = vld [vmem:[%s2504_s1 + $0x3d8] sm:$0xff]  ;;  %v1388_v46 = vpack.c.bf16 %v153_v39, %v152_v38  ;;  %v136_v47 = vld [vmem:[%s2504_s1 + $0x250] sm:$0xff]  ;;  %v154_v52 = vld [vmem:[%s2504_s1 + $0x2e0] sm:$0xff] }
  0x2a   :  { %1377 = vmatprep.subr.bf16.mxu0 %v1376_v1  ;;  %475 = vmatmul.mubr.f32.gmra.mrb[2].mxu1 %v32_v20  ;;  %v21_v44 = vld [vmem:[%s2505_s0 + $0x38] sm:$0xff]  ;;  %v168_v49 = vld [vmem:[%s2504_s1 + $0x350] sm:$0xff]  ;;  %v1420_v50 = vpack.c.bf16 %v185_v42, %v184_v41  ;;  %v155_v53 = vld [vmem:[%s2504_s1 + $0x2e8] sm:$0xff] }
  0x2b   :  { %1407 = vmatpush3.bf16.msra.mxu1 %v1406_v0  ;;  %479 = vmatprep.mubr.f32.mxu1 %v49_v31  ;;  %v137_v48 = vld [vmem:[%s2504_s1 + $0x258] sm:$0xff]  ;;  %v186_v54 = vld [vmem:[%s2504_s1 + $0x3e0] sm:$0xff]  ;;  %v187_v55 = vld [vmem:[%s2504_s1 + $0x3e8] sm:$0xff]  ;;  %v1392_v58 = vpack.c.bf16 %v155_v53, %v154_v52 }
  0x2c   :  { %1409 = vmatprep.subr.bf16.mxu1 %v1408_v5  ;;  %400 = vmatmul.mubr.f32.gmra.mrb[4].mxu0 %v46_v27  ;;  %v169_v51 = vld [vmem:[%s2504_s1 + $0x358] sm:$0xff]  ;;  %v1390_v56 = vpack.c.bf16 %v137_v48, %v136_v47  ;;  %v138_v59 = vld [vmem:[%s2504_s1 + $0x260] sm:$0xff]  ;;  %v139_v60 = vld [vmem:[%s2504_s1 + $0x268] sm:$0xff]  ;;  %v1424_v62 = vpack.c.bf16 %v187_v55, %v186_v54 }
  0x2d   :  { %1379 = vmatpush3.bf16.msra.mxu0 %v1378_v12  ;;  %549 = vmatprep.mubr.f32.mxu0 %v19_v40  ;;  %v1422_v57 = vpack.c.bf16 %v169_v51, %v168_v49  ;;  %v170_v61 = vld [vmem:[%s2504_s1 + $0x360] sm:$0xff]  ;;  %v171_v63 = vld [vmem:[%s2504_s1 + $0x368] sm:$0xff]  ;;  %v156_v0 = vld [vmem:[%s2504_s1 + $0x2f0] sm:$0xff]  ;;  %v1394_v4 = vpack.c.bf16 %v139_v60, %v138_v59 }
  0x2e   :  { %1381 = vmatprep.subr.bf16.mxu0 %v1380_v17  ;;  %480 = vmatmul.mubr.f32.gmra.mrb[4].mxu1 %v48_v36  ;;  %v157_v1 = vld [vmem:[%s2504_s1 + $0x2f8] sm:$0xff]  ;;  %v188_v2 = vld [vmem:[%s2504_s1 + $0x3f0] sm:$0xff]  ;;  %v1426_v5 = vpack.c.bf16 %v171_v63, %v170_v61  ;;  %v206_v12 = vld [vmem:[%s2504_s1 + $0x480] sm:$0xff] }
  0x2f   :  { %1411 = vmatpush3.bf16.msra.mxu1 %v1410_v16  ;;  %629 = vmatprep.mubr.f32.mxu1 %v21_v44  ;;  %v189_v3 = vld [vmem:[%s2504_s1 + $0x3f8] sm:$0xff]  ;;  %v1396_v6 = vpack.c.bf16 %v157_v1, %v156_v0  ;;  %v140_v7 = vld [vmem:[%s2504_s1 + $0x270] sm:$0xff]  ;;  %v207_v13 = vld [vmem:[%s2504_s1 + $0x488] sm:$0xff] }
  0x30   :  { %1413 = vmatprep.subr.bf16.mxu1 %v1412_v21  ;;  %v141_v8 = vld [vmem:[%s2504_s1 + $0x278] sm:$0xff]  ;;  %v172_v9 = vld [vmem:[%s2504_s1 + $0x370] sm:$0xff]  ;;  %v1428_v10 = vpack.c.bf16 %v189_v3, %v188_v2  ;;  %v238_v14 = vld [vmem:[%s2504_s1 + $0x580] sm:$0xff]  ;;  %v1432_v18 = vpack.c.bf16 %v207_v13, %v206_v12 }
  0x31   :  { %1383 = vmatpush3.bf16.msra.mxu0 %v1382_v28  ;;  %v173_v11 = vld [vmem:[%s2504_s1 + $0x378] sm:$0xff]  ;;  %v239_v15 = vld [vmem:[%s2504_s1 + $0x588] sm:$0xff]  ;;  %v1398_v16 = vpack.c.bf16 %v141_v8, %v140_v7  ;;  %v190_v19 = vld [vmem:[%s2504_s1 + $0x400] sm:$0xff] }
  0x32   :  { %1385 = vmatprep.subr.bf16.mxu0 %v1384_v33  ;;  %v1430_v17 = vpack.c.bf16 %v173_v11, %v172_v9  ;;  %v191_v20 = vld [vmem:[%s2504_s1 + $0x408] sm:$0xff]  ;;  %v1464_v21 = vpack.c.bf16 %v239_v15, %v238_v14  ;;  %v222_v22 = vld [vmem:[%s2504_s1 + $0x500] sm:$0xff]  ;;  %v208_v25 = vld [vmem:[%s2504_s1 + $0x490] sm:$0xff] }
  0x33   :  { %1415 = vmatpush3.bf16.msra.mxu1 %v1414_v32  ;;  %v223_v23 = vld [vmem:[%s2504_s1 + $0x508] sm:$0xff]  ;;  %v18_v24 = vld [vmem:[%s2505_s0 + $0x20] sm:$0xff]  ;;  %v209_v26 = vld [vmem:[%s2504_s1 + $0x498] sm:$0xff]  ;;  %v1434_v27 = vpack.c.bf16 %v191_v20, %v190_v19 }
  0x34   :  { %1417 = vmatprep.subr.bf16.mxu1 %v1416_v37  ;;  %v20_v28 = vld [vmem:[%s2505_s0 + $0x30] sm:$0xff]  ;;  %v241_v30 = vld [vmem:[%s2504_s1 + $0x598] sm:$0xff]  ;;  %v1466_v31 = vpack.c.bf16 %v223_v23, %v222_v22  ;;  %v35_v32 = vld [vmem:[%s2505_s0 + $0xa8] sm:$0xff]  ;;  %v1436_v36 = vpack.c.bf16 %v209_v26, %v208_v25 }
  0x35   :  { %1387 = vmatpush3.bf16.msra.mxu0 %v1386_v43  ;;  %v240_v29 = vld [vmem:[%s2504_s1 + $0x590] sm:$0xff]  ;;  %v193_v34 = vld [vmem:[%s2504_s1 + $0x418] sm:$0xff]  ;;  %v34_v35 = vld [vmem:[%s2505_s0 + $0xa0] sm:$0xff] }
  0x36   :  { %1389 = vmatprep.subr.bf16.mxu0 %v1388_v46  ;;  %v192_v33 = vld [vmem:[%s2504_s1 + $0x410] sm:$0xff]  ;;  %v37_v37 = vld [vmem:[%s2505_s0 + $0xb8] sm:$0xff]  ;;  %v1468_v40 = vpack.c.bf16 %v241_v30, %v240_v29  ;;  %v210_v42 = vld [vmem:[%s2504_s1 + $0x4a0] sm:$0xff] }
  0x37   :  { %1419 = vmatpush3.bf16.msra.mxu1 %v1418_v45  ;;  %v224_v38 = vld [vmem:[%s2504_s1 + $0x510] sm:$0xff]  ;;  %v225_v39 = vld [vmem:[%s2504_s1 + $0x518] sm:$0xff]  ;;  %v211_v43 = vld [vmem:[%s2504_s1 + $0x4a8] sm:$0xff]  ;;  %v1438_v44 = vpack.c.bf16 %v193_v34, %v192_v33 }
  0x38   :  { %1421 = vmatprep.subr.bf16.mxu1 %v1420_v50  ;;  %v36_v41 = vld [vmem:[%s2505_s0 + $0xb0] sm:$0xff]  ;;  %v51_v45 = vld [vmem:[%s2505_s0 + $0x128] sm:$0xff]  ;;  %v242_v46 = vld [vmem:[%s2504_s1 + $0x5a0] sm:$0xff]  ;;  %v1470_v48 = vpack.c.bf16 %v225_v39, %v224_v38  ;;  %v1440_v52 = vpack.c.bf16 %v211_v43, %v210_v42 }
  0x39   :  { %1391 = vmatpush3.bf16.msra.mxu0 %v1390_v56  ;;  %v243_v47 = vld [vmem:[%s2504_s1 + $0x5a8] sm:$0xff]  ;;  %v194_v49 = vld [vmem:[%s2504_s1 + $0x420] sm:$0xff]  ;;  %v212_v54 = vld [vmem:[%s2504_s1 + $0x4b0] sm:$0xff] }
  0x3a   :  { %1393 = vmatprep.subr.bf16.mxu0 %v1392_v58  ;;  %v195_v50 = vld [vmem:[%s2504_s1 + $0x428] sm:$0xff]  ;;  %v226_v51 = vld [vmem:[%s2504_s1 + $0x520] sm:$0xff]  ;;  %v213_v55 = vld [vmem:[%s2504_s1 + $0x4b8] sm:$0xff] }
  0x3b   :  { %1423 = vmatpush3.bf16.msra.mxu1 %v1422_v57  ;;  %v227_v53 = vld [vmem:[%s2504_s1 + $0x528] sm:$0xff]  ;;  %v53_v56 = vld [vmem:[%s2505_s0 + $0x138] sm:$0xff]  ;;  %v1472_v57 = vpack.c.bf16 %v243_v47, %v242_v46  ;;  %v244_v58 = vld [vmem:[%s2504_s1 + $0x5b0] sm:$0xff]  ;;  %v1442_v61 = vpack.c.bf16 %v195_v50, %v194_v49  ;;  %v1444_v0 = vpack.c.bf16 %v213_v55, %v212_v54 }
  0x3c   :  { %1425 = vmatprep.subr.bf16.mxu1 %v1424_v62  ;;  %v245_v59 = vld [vmem:[%s2504_s1 + $0x5b8] sm:$0xff]  ;;  %v50_v60 = vld [vmem:[%s2505_s0 + $0x120] sm:$0xff]  ;;  %v52_v62 = vld [vmem:[%s2505_s0 + $0x130] sm:$0xff]  ;;  %v1474_v63 = vpack.c.bf16 %v227_v53, %v226_v51 }
  0x3d   :  { %1395 = vmatpush3.bf16.msra.mxu0 %v1394_v4  ;;  %v196_v1 = vld [vmem:[%s2504_s1 + $0x430] sm:$0xff]  ;;  %v197_v2 = vld [vmem:[%s2504_s1 + $0x438] sm:$0xff]  ;;  %v1476_v4 = vpack.c.bf16 %v245_v59, %v244_v58  ;;  %v215_v7 = vld [vmem:[%s2504_s1 + $0x4c8] sm:$0xff] }
  0x3e   :  { %1397 = vmatprep.subr.bf16.mxu0 %v1396_v6  ;;  %v228_v3 = vld [vmem:[%s2504_s1 + $0x530] sm:$0xff]  ;;  %v214_v6 = vld [vmem:[%s2504_s1 + $0x4c0] sm:$0xff]  ;;  %v247_v9 = vld [vmem:[%s2504_s1 + $0x5c8] sm:$0xff]  ;;  %v1446_v11 = vpack.c.bf16 %v197_v2, %v196_v1 }
  0x3f   :  { %1427 = vmatpush3.bf16.msra.mxu1 %v1426_v5  ;;  %v229_v5 = vld [vmem:[%s2504_s1 + $0x538] sm:$0xff]  ;;  %v246_v8 = vld [vmem:[%s2504_s1 + $0x5c0] sm:$0xff]  ;;  %v1448_v14 = vpack.c.bf16 %v215_v7, %v214_v6  ;;  %v231_v19 = vld [vmem:[%s2504_s1 + $0x548] sm:$0xff] }
  0x40   :  { %1429 = vmatprep.subr.bf16.mxu1 %v1428_v10  ;;  %v23_v10 = vld [vmem:[%s2505_s0 + $0x48] sm:$0xff]  ;;  %v25_v12 = vld [vmem:[%s2505_s0 + $0x58] sm:$0xff]  ;;  %v1478_v13 = vpack.c.bf16 %v229_v5, %v228_v3  ;;  %v198_v15 = vld [vmem:[%s2504_s1 + $0x440] sm:$0xff] }
  0x41   :  { %1399 = vmatpush3.bf16.msra.mxu0 %v1398_v16  ;;  %v199_v16 = vld [vmem:[%s2504_s1 + $0x448] sm:$0xff]  ;;  %v216_v20 = vld [vmem:[%s2504_s1 + $0x4d0] sm:$0xff]  ;;  %v249_v23 = vld [vmem:[%s2504_s1 + $0x5d8] sm:$0xff] }
  0x42   :  { %1433 = vmatprep.subr.bf16.mxu0 %v1432_v18  ;;  %v1480_v18 = vpack.c.bf16 %v247_v9, %v246_v8  ;;  %v248_v22 = vld [vmem:[%s2504_s1 + $0x5d0] sm:$0xff]  ;;  %v219_v33 = vld [vmem:[%s2504_s1 + $0x4e8] sm:$0xff]  ;;  %v250_v34 = vld [vmem:[%s2504_s1 + $0x5e0] sm:$0xff] }
  0x43   :  { %1431 = vmatpush3.bf16.msra.mxu1 %v1430_v17  ;;  %v230_v17 = vld [vmem:[%s2504_s1 + $0x540] sm:$0xff]  ;;  %v232_v29 = vld [vmem:[%s2504_s1 + $0x550] sm:$0xff]  ;;  %v1484_v30 = vpack.c.bf16 %v249_v23, %v248_v22  ;;  %v235_v43 = vld [vmem:[%s2504_s1 + $0x568] sm:$0xff] }
  0x44   :  { %1465 = vmatprep.subr.bf16.mxu1 %v1464_v21  ;;  %550 = vmatmul.mubr.f32.vlgmr.msra.gmra.mrb[6].mxu0 %v18_v24  ;;  %v217_v21 = vld [vmem:[%s2504_s1 + $0x4d8] sm:$0xff]  ;;  %v1450_v24 = vpack.c.bf16 %v199_v16, %v198_v15  ;;  %v1482_v25 = vpack.c.bf16 %v231_v19, %v230_v17  ;;  %v202_v39 = vld [vmem:[%s2504_s1 + $0x460] sm:$0xff]  ;;  %v252_v46 = vld [vmem:[%s2504_s1 + $0x5f0] sm:$0xff] }
  0x45   :  { %1435 = vmatpush3.bf16.msra.mxu0 %v1434_v27  ;;  %554 = vmatprep.mubr.f32.mxu0 %v35_v32  ;;  %v1452_v26 = vpack.c.bf16 %v217_v21, %v216_v20  ;;  %v200_v27 = vld [vmem:[%s2504_s1 + $0x450] sm:$0xff]  ;;  %v218_v32 = vld [vmem:[%s2504_s1 + $0x4e0] sm:$0xff]  ;;  %v253_v47 = vld [vmem:[%s2504_s1 + $0x5f8] sm:$0xff] }
  0x46   :  { %630 = vmatmul.mubr.f32.vlgmr.msra.gmra.mrb[6].mxu1 %v20_v28  ;;  %1437 = vmatprep.subr.bf16.mxu0 %v1436_v36  ;;  %v201_v28 = vld [vmem:[%s2504_s1 + $0x458] sm:$0xff]  ;;  %v1456_v38 = vpack.c.bf16 %v219_v33, %v218_v32  ;;  %v204_v51 = vld [vmem:[%s2504_s1 + $0x470] sm:$0xff]  ;;  %v1492_v54 = vpack.c.bf16 %v253_v47, %v252_v46  ;;  %v302_v58 = vld [vmem:[%s2504_s1 + $0x780] sm:$0xff] }
  0x47   :  { %1467 = vmatpush3.bf16.msra.mxu1 %v1466_v31  ;;  %634 = vmatprep.mubr.f32.mxu1 %v37_v37  ;;  %v233_v31 = vld [vmem:[%s2504_s1 + $0x558] sm:$0xff]  ;;  %v1454_v36 = vpack.c.bf16 %v201_v28, %v200_v27  ;;  %v236_v53 = vld [vmem:[%s2504_s1 + $0x570] sm:$0xff]  ;;  %v303_v59 = vld [vmem:[%s2504_s1 + $0x788] sm:$0xff] }
  0x48   :  { %555 = vmatmul.mubr.f32.gmra.mrb[8].mxu0 %v34_v35  ;;  %1469 = vmatprep.subr.bf16.mxu1 %v1468_v40  ;;  %v251_v35 = vld [vmem:[%s2504_s1 + $0x5e8] sm:$0xff]  ;;  %v1486_v37 = vpack.c.bf16 %v233_v31, %v232_v29  ;;  %v237_v55 = vld [vmem:[%s2504_s1 + $0x578] sm:$0xff]  ;;  %v1528_v1 = vpack.c.bf16 %v303_v59, %v302_v58  ;;  %v286_v2 = vld [vmem:[%s2504_s1 + $0x700] sm:$0xff] }
  0x49   :  { %1439 = vmatpush3.bf16.msra.mxu0 %v1438_v44  ;;  %559 = vmatprep.mubr.f32.mxu0 %v51_v45  ;;  %v203_v40 = vld [vmem:[%s2504_s1 + $0x468] sm:$0xff]  ;;  %v1488_v42 = vpack.c.bf16 %v251_v35, %v250_v34  ;;  %v220_v44 = vld [vmem:[%s2504_s1 + $0x4f0] sm:$0xff]  ;;  %v221_v45 = vld [vmem:[%s2504_s1 + $0x4f8] sm:$0xff] }
  0x4a   :  { %635 = vmatmul.mubr.f32.gmra.mrb[8].mxu1 %v36_v41  ;;  %1441 = vmatprep.subr.bf16.mxu0 %v1440_v52  ;;  %v234_v41 = vld [vmem:[%s2504_s1 + $0x560] sm:$0xff]  ;;  %v1460_v50 = vpack.c.bf16 %v221_v45, %v220_v44  ;;  %v205_v52 = vld [vmem:[%s2504_s1 + $0x478] sm:$0xff]  ;;  %v287_v3 = vld [vmem:[%s2504_s1 + $0x708] sm:$0xff] }
  0x4b   :  { %1471 = vmatpush3.bf16.msra.mxu1 %v1470_v48  ;;  %639 = vmatprep.mubr.f32.mxu1 %v53_v56  ;;  %v1458_v48 = vpack.c.bf16 %v203_v40, %v202_v39  ;;  %v1490_v49 = vpack.c.bf16 %v235_v43, %v234_v41  ;;  %v270_v56 = vld [vmem:[%s2504_s1 + $0x680] sm:$0xff]  ;;  %v272_v5 = vld [vmem:[%s2504_s1 + $0x690] sm:$0xff]  ;;  %v273_v6 = vld [vmem:[%s2504_s1 + $0x698] sm:$0xff] }
  0x4c   :  { %560 = vmatmul.mubr.f32.gmra.mrb[10].mxu0 %v50_v60  ;;  %1473 = vmatprep.subr.bf16.mxu1 %v1472_v57  ;;  %v271_v57 = vld [vmem:[%s2504_s1 + $0x688] sm:$0xff]  ;;  %v1462_v60 = vpack.c.bf16 %v205_v52, %v204_v51  ;;  %v24_v8 = vld [vmem:[%s2505_s0 + $0x50] sm:$0xff]  ;;  %v38_v15 = vld [vmem:[%s2505_s0 + $0xc0] sm:$0xff]  ;;  %v1500_v16 = vpack.c.bf16 %v273_v6, %v272_v5 }
  0x4d   :  { %1443 = vmatpush3.bf16.msra.mxu0 %v1442_v61  ;;  %709 = vmatprep.mubr.f32.mxu0 %v23_v10  ;;  %v1494_v61 = vpack.c.bf16 %v237_v55, %v236_v53  ;;  %v304_v9 = vld [vmem:[%s2504_s1 + $0x790] sm:$0xff]  ;;  %v305_v10 = vld [vmem:[%s2504_s1 + $0x798] sm:$0xff]  ;;  %v274_v22 = vld [vmem:[%s2504_s1 + $0x6a0] sm:$0xff] }
  0x4e   :  { %640 = vmatmul.mubr.f32.gmra.mrb[10].mxu1 %v52_v62  ;;  %1445 = vmatprep.subr.bf16.mxu0 %v1444_v0  ;;  %v1496_v62 = vpack.c.bf16 %v271_v57, %v270_v56  ;;  %v255_v0 = vld [vmem:[%s2504_s1 + $0x608] sm:$0xff]  ;;  %v41_v17 = vld [vmem:[%s2505_s0 + $0xd8] sm:$0xff]  ;;  %v1532_v20 = vpack.c.bf16 %v305_v10, %v304_v9  ;;  %v40_v21 = vld [vmem:[%s2505_s0 + $0xd0] sm:$0xff] }
  0x4f   :  { %1475 = vmatpush3.bf16.msra.mxu1 %v1474_v63  ;;  %789 = vmatprep.mubr.f32.mxu1 %v25_v12  ;;  %v254_v63 = vld [vmem:[%s2504_s1 + $0x600] sm:$0xff]  ;;  %v39_v12 = vld [vmem:[%s2505_s0 + $0xc8] sm:$0xff]  ;;  %v289_v19 = vld [vmem:[%s2504_s1 + $0x718] sm:$0xff] }
  0x50   :  { %1477 = vmatprep.subr.bf16.mxu1 %v1476_v4  ;;  %v22_v4 = vld [vmem:[%s2505_s0 + $0x40] sm:$0xff]  ;;  %v1498_v7 = vpack.c.bf16 %v255_v0, %v254_v63  ;;  %v275_v23 = vld [vmem:[%s2504_s1 + $0x6a8] sm:$0xff]  ;;  %v276_v34 = vld [vmem:[%s2504_s1 + $0x6b0] sm:$0xff] }
  0x51   :  { %1447 = vmatpush3.bf16.msra.mxu0 %v1446_v11  ;;  %v1530_v11 = vpack.c.bf16 %v287_v3, %v286_v2  ;;  %v307_v27 = vld [vmem:[%s2504_s1 + $0x7a8] sm:$0xff]  ;;  %v258_v29 = vld [vmem:[%s2504_s1 + $0x620] sm:$0xff]  ;;  %v1504_v32 = vpack.c.bf16 %v275_v23, %v274_v22  ;;  %v277_v35 = vld [vmem:[%s2504_s1 + $0x6b8] sm:$0xff] }
  0x52   :  { %1449 = vmatprep.subr.bf16.mxu0 %v1448_v14  ;;  %v257_v14 = vld [vmem:[%s2504_s1 + $0x618] sm:$0xff]  ;;  %v290_v31 = vld [vmem:[%s2504_s1 + $0x720] sm:$0xff]  ;;  %v291_v33 = vld [vmem:[%s2504_s1 + $0x728] sm:$0xff]  ;;  %v1508_v44 = vpack.c.bf16 %v277_v35, %v276_v34 }
  0x53   :  { %1479 = vmatpush3.bf16.msra.mxu1 %v1478_v13  ;;  %v256_v13 = vld [vmem:[%s2504_s1 + $0x610] sm:$0xff]  ;;  %v309_v39 = vld [vmem:[%s2504_s1 + $0x7b8] sm:$0xff]  ;;  %v54_v40 = vld [vmem:[%s2505_s0 + $0x140] sm:$0xff]  ;;  %v1538_v43 = vpack.c.bf16 %v291_v33, %v290_v31 }
  0x54   :  { %1481 = vmatprep.subr.bf16.mxu1 %v1480_v18  ;;  %v288_v18 = vld [vmem:[%s2504_s1 + $0x710] sm:$0xff]  ;;  %v261_v46 = vld [vmem:[%s2504_s1 + $0x638] sm:$0xff]  ;;  %v279_v51 = vld [vmem:[%s2504_s1 + $0x6c8] sm:$0xff] }
  0x55   :  { %1451 = vmatpush3.bf16.msra.mxu0 %v1450_v24  ;;  %v1502_v24 = vpack.c.bf16 %v257_v14, %v256_v13  ;;  %v1534_v28 = vpack.c.bf16 %v289_v19, %v288_v18  ;;  %v260_v45 = vld [vmem:[%s2504_s1 + $0x630] sm:$0xff]  ;;  %v310_v52 = vld [vmem:[%s2504_s1 + $0x7c0] sm:$0xff]  ;;  %v311_v53 = vld [vmem:[%s2504_s1 + $0x7c8] sm:$0xff] }
  0x56   :  { %1453 = vmatprep.subr.bf16.mxu0 %v1452_v26  ;;  %v306_v26 = vld [vmem:[%s2504_s1 + $0x7a0] sm:$0xff]  ;;  %v292_v47 = vld [vmem:[%s2504_s1 + $0x730] sm:$0xff]  ;;  %v1510_v55 = vpack.c.bf16 %v261_v46, %v260_v45  ;;  %v29_v56 = vld [vmem:[%s2505_s0 + $0x78] sm:$0xff] }
  0x57   :  { %1483 = vmatpush3.bf16.msra.mxu1 %v1482_v25  ;;  %v55_v25 = vld [vmem:[%s2505_s0 + $0x148] sm:$0xff]  ;;  %v262_v59 = vld [vmem:[%s2504_s1 + $0x640] sm:$0xff]  ;;  %v280_v0 = vld [vmem:[%s2504_s1 + $0x6d0] sm:$0xff] }
  0x58   :  { %1485 = vmatprep.subr.bf16.mxu1 %v1484_v30  ;;  %v259_v30 = vld [vmem:[%s2504_s1 + $0x628] sm:$0xff]  ;;  %v312_v2 = vld [vmem:[%s2504_s1 + $0x7d0] sm:$0xff]  ;;  %v313_v3 = vld [vmem:[%s2504_s1 + $0x7d8] sm:$0xff] }
  0x59   :  { %1455 = vmatpush3.bf16.msra.mxu0 %v1454_v36  ;;  %v57_v36 = vld [vmem:[%s2505_s0 + $0x158] sm:$0xff]  ;;  %v1506_v41 = vpack.c.bf16 %v259_v30, %v258_v29  ;;  %v295_v63 = vld [vmem:[%s2504_s1 + $0x748] sm:$0xff]  ;;  %v296_v9 = vld [vmem:[%s2504_s1 + $0x750] sm:$0xff]  ;;  %v1548_v10 = vpack.c.bf16 %v313_v3, %v312_v2 }
  0x5a   :  { %1457 = vmatprep.subr.bf16.mxu0 %v1456_v38  ;;  %v308_v38 = vld [vmem:[%s2504_s1 + $0x7b0] sm:$0xff]  ;;  %v283_v13 = vld [vmem:[%s2504_s1 + $0x6e8] sm:$0xff]  ;;  %v314_v14 = vld [vmem:[%s2504_s1 + $0x7e0] sm:$0xff] }
  0x5b   :  { %1487 = vmatpush3.bf16.msra.mxu1 %v1486_v37  ;;  %v1536_v37 = vpack.c.bf16 %v307_v27, %v306_v26  ;;  %v266_v19 = vld [vmem:[%s2504_s1 + $0x660] sm:$0xff]  ;;  %v299_v23 = vld [vmem:[%s2504_s1 + $0x768] sm:$0xff]  ;;  %v316_v26 = vld [vmem:[%s2504_s1 + $0x7f0] sm:$0xff] }
  0x5c   :  { %1489 = vmatprep.subr.bf16.mxu1 %v1488_v42  ;;  %v56_v42 = vld [vmem:[%s2505_s0 + $0x150] sm:$0xff]  ;;  %v317_v27 = vld [vmem:[%s2504_s1 + $0x7f8] sm:$0xff]  ;;  %v58_v46 = vld [vmem:[%s2505_s0 + $0x160] sm:$0xff] }
  0x5d   :  { %1459 = vmatpush3.bf16.msra.mxu0 %v1458_v48  ;;  %v1540_v48 = vpack.c.bf16 %v309_v39, %v308_v38  ;;  %v268_v31 = vld [vmem:[%s2504_s1 + $0x670] sm:$0xff]  ;;  %v1556_v33 = vpack.c.bf16 %v317_v27, %v316_v26  ;;  %v301_v35 = vld [vmem:[%s2504_s1 + $0x778] sm:$0xff]  ;;  %v26_v38 = vld [vmem:[%s2505_s0 + $0x60] sm:$0xff] }
  0x5e   :  { %1461 = vmatprep.subr.bf16.mxu0 %v1460_v50  ;;  %v278_v50 = vld [vmem:[%s2504_s1 + $0x6c0] sm:$0xff]  ;;  %v300_v34 = vld [vmem:[%s2504_s1 + $0x770] sm:$0xff]  ;;  %v61_v45 = vld [vmem:[%s2505_s0 + $0x178] sm:$0xff] }
  0x5f   :  { %1491 = vmatpush3.bf16.msra.mxu1 %v1490_v49  ;;  %v293_v49 = vld [vmem:[%s2504_s1 + $0x738] sm:$0xff]  ;;  %v1512_v58 = vpack.c.bf16 %v279_v51, %v278_v50  ;;  %v28_v39 = vld [vmem:[%s2505_s0 + $0x70] sm:$0xff] }
  0x60   :  { %1493 = vmatprep.subr.bf16.mxu1 %v1492_v54  ;;  %v27_v54 = vld [vmem:[%s2505_s0 + $0x68] sm:$0xff]  ;;  %v1542_v57 = vpack.c.bf16 %v293_v49, %v292_v47  ;;  %v60_v47 = vld [vmem:[%s2505_s0 + $0x170] sm:$0xff]  ;;  %v975_v49 = vld [vmem:[%s2506_s2] ss:$0 sm:$0xff] }
  0x61   :  { %1463 = vmatpush3.bf16.msra.mxu0 %v1462_v60  ;;  %v263_v60 = vld [vmem:[%s2504_s1 + $0x648] sm:$0xff] }
  0x62   :  { %1497 = vmatprep.subr.bf16.mxu0 %v1496_v62  ;;  %v1544_v62 = vpack.c.bf16 %v311_v53, %v310_v52 }
  0x63   :  { %1495 = vmatpush3.bf16.msra.mxu1 %v1494_v61  ;;  %v294_v61 = vld [vmem:[%s2504_s1 + $0x740] sm:$0xff] }
  0x64   :  { %1529 = vmatprep.subr.bf16.mxu1 %v1528_v1  ;;  %710 = vmatmul.mubr.f32.vlgmr.msra.gmra.mrb[12].mxu0 %v22_v4  ;;  %v281_v1 = vld [vmem:[%s2504_s1 + $0x6d8] sm:$0xff]  ;;  %v1514_v4 = vpack.c.bf16 %v263_v60, %v262_v59  ;;  %v1546_v5 = vpack.c.bf16 %v295_v63, %v294_v61 }
  0x65   :  { %1499 = vmatpush3.bf16.msra.mxu0 %v1498_v7  ;;  %714 = vmatprep.mubr.f32.mxu0 %v39_v12  ;;  %v1516_v6 = vpack.c.bf16 %v281_v1, %v280_v0  ;;  %v264_v7 = vld [vmem:[%s2504_s1 + $0x650] sm:$0xff]  ;;  %v282_v12 = vld [vmem:[%s2504_s1 + $0x6e0] sm:$0xff] }
  0x66   :  { %790 = vmatmul.mubr.f32.vlgmr.msra.gmra.mrb[12].mxu1 %v24_v8  ;;  %1501 = vmatprep.subr.bf16.mxu0 %v1500_v16  ;;  %v265_v8 = vld [vmem:[%s2504_s1 + $0x658] sm:$0xff]  ;;  %v1520_v18 = vpack.c.bf16 %v283_v13, %v282_v12 }
  0x67   :  { %1531 = vmatpush3.bf16.msra.mxu1 %v1530_v11  ;;  %794 = vmatprep.mubr.f32.mxu1 %v41_v17  ;;  %v297_v11 = vld [vmem:[%s2504_s1 + $0x758] sm:$0xff]  ;;  %v1518_v16 = vpack.c.bf16 %v265_v8, %v264_v7 }
  0x68   :  { %715 = vmatmul.mubr.f32.gmra.mrb[14].mxu0 %v38_v15  ;;  %1533 = vmatprep.subr.bf16.mxu1 %v1532_v20  ;;  %v315_v15 = vld [vmem:[%s2504_s1 + $0x7e8] sm:$0xff]  ;;  %v1550_v17 = vpack.c.bf16 %v297_v11, %v296_v9 }
  0x69   :  { %1503 = vmatpush3.bf16.msra.mxu0 %v1502_v24  ;;  %719 = vmatprep.mubr.f32.mxu0 %v55_v25  ;;  %v267_v20 = vld [vmem:[%s2504_s1 + $0x668] sm:$0xff]  ;;  %v1552_v22 = vpack.c.bf16 %v315_v15, %v314_v14  ;;  %v284_v24 = vld [vmem:[%s2504_s1 + $0x6f0] sm:$0xff]  ;;  %v285_v25 = vld [vmem:[%s2504_s1 + $0x6f8] sm:$0xff] }
  0x6a   :  { %795 = vmatmul.mubr.f32.gmra.mrb[14].mxu1 %v40_v21  ;;  %1505 = vmatprep.subr.bf16.mxu0 %v1504_v32  ;;  %v298_v21 = vld [vmem:[%s2504_s1 + $0x760] sm:$0xff]  ;;  %v1524_v30 = vpack.c.bf16 %v285_v25, %v284_v24  ;;  %v269_v32 = vld [vmem:[%s2504_s1 + $0x678] sm:$0xff] }
  0x6b   :  { %1535 = vmatpush3.bf16.msra.mxu1 %v1534_v28  ;;  %799 = vmatprep.mubr.f32.mxu1 %v57_v36  ;;  %v1522_v28 = vpack.c.bf16 %v267_v20, %v266_v19  ;;  %v1554_v29 = vpack.c.bf16 %v299_v23, %v298_v21  ;;  %v1526_v36 = vpack.c.bf16 %v269_v32, %v268_v31 }
  0x6c   :  { %720 = vmatmul.mubr.f32.gmra.mrb[16].mxu0 %v54_v40  ;;  %1537 = vmatprep.subr.bf16.mxu1 %v1536_v37  ;;  %v1558_v37 = vpack.c.bf16 %v301_v35, %v300_v34  ;;  %v43_v40 = vld [vmem:[%s2505_s0 + $0xe8] sm:$0xff] }
  0x6d   :  { %1507 = vmatpush3.bf16.msra.mxu0 %v1506_v41  ;;  %869 = vmatprep.mubr.f32.mxu0 %v27_v54  ;;  %v45_v41 = vld [vmem:[%s2505_s0 + $0xf8] sm:$0xff] }
  0x6e   :  { %800 = vmatmul.mubr.f32.gmra.mrb[16].mxu1 %v56_v42  ;;  %1509 = vmatprep.subr.bf16.mxu0 %v1508_v44  ;;  %v42_v42 = vld [vmem:[%s2505_s0 + $0xe0] sm:$0xff]  ;;  %v59_v44 = vld [vmem:[%s2505_s0 + $0x168] sm:$0xff] }
  0x6f   :  { %1539 = vmatpush3.bf16.msra.mxu1 %v1538_v43  ;;  %949 = vmatprep.mubr.f32.mxu1 %v29_v56  ;;  %v44_v43 = vld [vmem:[%s2505_s0 + $0xf0] sm:$0xff] }
  0x70   :  { %1541 = vmatprep.subr.bf16.mxu1 %v1540_v48 }
  0x71   :  { %1511 = vmatpush3.bf16.msra.mxu0 %v1510_v55 }
  0x72   :  { %1513 = vmatprep.subr.bf16.mxu0 %v1512_v58 }
  0x73   :  { %1543 = vmatpush3.bf16.msra.mxu1 %v1542_v57 }
  0x74   :  { %1545 = vmatprep.subr.bf16.mxu1 %v1544_v62 }
  0x75   :  { %1515 = vmatpush3.bf16.msra.mxu0 %v1514_v4 }
  0x76   :  { %1517 = vmatprep.subr.bf16.mxu0 %v1516_v6 }
  0x77   :  { %1547 = vmatpush3.bf16.msra.mxu1 %v1546_v5 }
  0x78   :  { %1549 = vmatprep.subr.bf16.mxu1 %v1548_v10 }
  0x79   :  { %1519 = vmatpush3.bf16.msra.mxu0 %v1518_v16 }
  0x7a   :  { %1521 = vmatprep.subr.bf16.mxu0 %v1520_v18 }
  0x7b   :  { %1551 = vmatpush3.bf16.msra.mxu1 %v1550_v17 }
  0x7c   :  { %1553 = vmatprep.subr.bf16.mxu1 %v1552_v22 }
  0x7d   :  { %1523 = vmatpush3.bf16.msra.mxu0 %v1522_v28 }
  0x7e   :  { %1525 = vmatprep.subr.bf16.mxu0 %v1524_v30 }
  0x7f   :  { %1555 = vmatpush3.bf16.msra.mxu1 %v1554_v29 }
  0x80   :  { %1557 = vmatprep.subr.bf16.mxu1 %v1556_v33 }
  0x81   :  { %1527 = vmatpush3.bf16.msra.mxu0 %v1526_v36 }
  0x83   :  { %1559 = vmatpush3.bf16.msra.mxu1 %v1558_v37 }
  0x84   :  { %870 = vmatmul.mubr.f32.vlgmr.msra.gmra.mrb[18].mxu0 %v26_v38 }
  0x85   :  { %874 = vmatprep.mubr.f32.mxu0 %v43_v40 }
  0x86   :  { %950 = vmatmul.mubr.f32.vlgmr.msra.gmra.mrb[18].mxu1 %v28_v39 }
  0x87   :  { %954 = vmatprep.mubr.f32.mxu1 %v45_v41 }
  0x88   :  { %875 = vmatmul.mubr.f32.gmra.mrb[20].mxu0 %v42_v42 }
  0x89   :  { %879 = vmatprep.mubr.f32.mxu0 %v59_v44 }
  0x8a   :  { %955 = vmatmul.mubr.f32.gmra.mrb[20].mxu1 %v44_v43 }
  0x8b   :  { %959 = vmatprep.mubr.f32.mxu1 %v61_v45 }
  0x8c   :  { %880 = vmatmul.mubr.f32.gmra.mrb[22].mxu0 %v58_v46 }
  0x8e   :  { %960 = vmatmul.mubr.f32.gmra.mrb[22].mxu1 %v60_v47 }
  0xf7   :  { %v1008_v48 = vpop.f32.mrb[0].mxu0 }
  0xf8   :  { %v1009_v50 = vpop.f32.mrb[1].mxu0 }
  0xf9   :  { %v1049_v51 = vpop.f32.mrb[0].mxu1  ;;  %v1010_v52 = vadd.f32 %v1009_v50, %v1008_v48 }
  0xfa   :  { %v1050_v53 = vpop.f32.mrb[1].mxu1 }
  0xfb   :  { %v1051_v54 = vadd.f32 %v1050_v53, %v1049_v51  ;;  %v392_v55 = vadd.f32 %v1010_v52, %v975_v49  ;;  %v1011_v57 = vpop.f32.mrb[2].mxu0 }
  0xfc   :  { %v1012_v58 = vpop.f32.mrb[3].mxu0 }
  0xfd   :  { %v472_v56 = vadd.f32 %v1051_v54, %v392_v55  ;;  %v1013_v59 = vadd.f32 %v1012_v58, %v1011_v57  ;;  %v1052_v60 = vpop.f32.mrb[2].mxu1 }
  0xfe   :  { %v1053_v61 = vpop.f32.mrb[3].mxu1 }
  0xff   :  { %v397_v62 = vadd.f32 %v1013_v59, %v975_v49  ;;  %v1054_v63 = vadd.f32 %v1053_v61, %v1052_v60  ;;  %v1014_v0 = vpop.f32.mrb[4].mxu0 }
 0x100   :  { %v1015_v1 = vpop.f32.mrb[5].mxu0 }
 0x101   :  { %v477_v2 = vadd.f32 %v1054_v63, %v397_v62  ;;  %v1016_v3 = vadd.f32 %v1015_v1, %v1014_v0  ;;  %v1055_v4 = vpop.f32.mrb[4].mxu1 }
 0x102   :  { %v1056_v5 = vpop.f32.mrb[5].mxu1 }
 0x103   :  { %v402_v6 = vadd.f32 %v1016_v3, %v975_v49  ;;  %v1057_v7 = vadd.f32 %v1056_v5, %v1055_v4 }
 0x105   :  { %v482_v8 = vadd.f32 %v1057_v7, %v402_v6 }
 0x117   :  { %v1090_v9 = vpop.f32.mrb[6].mxu0 }
 0x118   :  { %v1091_v10 = vpop.f32.mrb[7].mxu0 }
 0x119   :  { %v1131_v11 = vpop.f32.mrb[6].mxu1  ;;  %v1092_v12 = vadd.f32 %v1091_v10, %v1090_v9 }
 0x11a   :  { %v1132_v13 = vpop.f32.mrb[7].mxu1 }
 0x11b   :  { %v1133_v14 = vadd.f32 %v1132_v13, %v1131_v11  ;;  %v552_v15 = vadd.f32 %v1092_v12, %v472_v56  ;;  %v1093_v16 = vpop.f32.mrb[8].mxu0 }
 0x11c   :  { %v1094_v17 = vpop.f32.mrb[9].mxu0 }
 0x11d   :  { %v1134_v18 = vpop.f32.mrb[8].mxu1  ;;  %v632_v19 = vadd.f32 %v1133_v14, %v552_v15  ;;  %v1095_v20 = vadd.f32 %v1094_v17, %v1093_v16 }
 0x11e   :  { %v1135_v21 = vpop.f32.mrb[9].mxu1 }
 0x11f   :  { %v1136_v22 = vadd.f32 %v1135_v21, %v1134_v18  ;;  %v557_v23 = vadd.f32 %v1095_v20, %v477_v2  ;;  %v1096_v24 = vpop.f32.mrb[10].mxu0 }
 0x120   :  { %v1097_v25 = vpop.f32.mrb[11].mxu0 }
 0x121   :  { %v1137_v26 = vpop.f32.mrb[10].mxu1  ;;  %v637_v27 = vadd.f32 %v1136_v22, %v557_v23  ;;  %v1098_v28 = vadd.f32 %v1097_v25, %v1096_v24 }
 0x122   :  { %v1138_v29 = vpop.f32.mrb[11].mxu1 }
 0x123   :  { %v1139_v30 = vadd.f32 %v1138_v29, %v1137_v26  ;;  %v562_v31 = vadd.f32 %v1098_v28, %v482_v8 }
 0x125   :  { %v642_v32 = vadd.f32 %v1139_v30, %v562_v31 }
 0x137   :  { %v1172_v33 = vpop.f32.mrb[12].mxu0 }
 0x138   :  { %v1173_v34 = vpop.f32.mrb[13].mxu0 }
 0x139   :  { %v1213_v35 = vpop.f32.mrb[12].mxu1  ;;  %v1174_v36 = vadd.f32 %v1173_v34, %v1172_v33 }
 0x13a   :  { %v1214_v37 = vpop.f32.mrb[13].mxu1 }
 0x13b   :  { %v1215_v38 = vadd.f32 %v1214_v37, %v1213_v35  ;;  %v712_v39 = vadd.f32 %v1174_v36, %v632_v19  ;;  %v1175_v40 = vpop.f32.mrb[14].mxu0 }
 0x13c   :  { %v1176_v41 = vpop.f32.mrb[15].mxu0 }
 0x13d   :  { %v1216_v42 = vpop.f32.mrb[14].mxu1  ;;  %v792_v43 = vadd.f32 %v1215_v38, %v712_v39  ;;  %v1177_v44 = vadd.f32 %v1176_v41, %v1175_v40 }
 0x13e   :  { %v1217_v45 = vpop.f32.mrb[15].mxu1 }
 0x13f   :  { %v1218_v46 = vadd.f32 %v1217_v45, %v1216_v42  ;;  %v717_v47 = vadd.f32 %v1177_v44, %v637_v27  ;;  %v1178_v48 = vpop.f32.mrb[16].mxu0 }
 0x140   :  { %v1179_v49 = vpop.f32.mrb[17].mxu0 }
 0x141   :  { %v1219_v50 = vpop.f32.mrb[16].mxu1  ;;  %v797_v51 = vadd.f32 %v1218_v46, %v717_v47  ;;  %v1180_v52 = vadd.f32 %v1179_v49, %v1178_v48 }
 0x142   :  { %v1220_v53 = vpop.f32.mrb[17].mxu1 }
 0x143   :  { %v1221_v54 = vadd.f32 %v1220_v53, %v1219_v50  ;;  %v722_v55 = vadd.f32 %v1180_v52, %v642_v32 }
 0x145   :  { %v802_v56 = vadd.f32 %v1221_v54, %v722_v55 }
 0x157   :  { %v1254_v57 = vpop.f32.mrb[18].mxu0 }
 0x158   :  { %v1255_v58 = vpop.f32.mrb[19].mxu0 }
 0x159   :  { %v1295_v59 = vpop.f32.mrb[18].mxu1  ;;  %v1256_v60 = vadd.f32 %v1255_v58, %v1254_v57 }
 0x15a   :  { %v1296_v61 = vpop.f32.mrb[19].mxu1 }
 0x15b   :  { %v1297_v62 = vadd.f32 %v1296_v61, %v1295_v59  ;;  %v872_v63 = vadd.f32 %v1256_v60, %v792_v43  ;;  %v1257_v0 = vpop.f32.mrb[20].mxu0 }
 0x15c   :  { %v1258_v1 = vpop.f32.mrb[21].mxu0 }
 0x15d   :  { %v1298_v2 = vpop.f32.mrb[20].mxu1  ;;  %v952_v3 = vadd.f32 %v1297_v62, %v872_v63  ;;  %v1259_v4 = vadd.f32 %v1258_v1, %v1257_v0 }
 0x15e   :  { %v1299_v5 = vpop.f32.mrb[21].mxu1 }
 0x15f   :  { %v1300_v6 = vadd.f32 %v1299_v5, %v1298_v2  ;;  %v965_v7 = vmax.f32 %v952_v3, 0.0  ;;  %v877_v8 = vadd.f32 %v1259_v4, %v797_v51  ;;  %v1260_v9 = vpop.f32.mrb[22].mxu0 }
 0x160   :  { %v1261_v10 = vpop.f32.mrb[23].mxu0 }
 0x161   :  { %v1301_v11 = vpop.f32.mrb[22].mxu1  ;;  %968 = vst [vmem:[%s2507_s3] sm:$0xff] %v965_v7  ;;  %v957_v12 = vadd.f32 %v1300_v6, %v877_v8  ;;  %v1262_v13 = vadd.f32 %v1261_v10, %v1260_v9 }
 0x162   :  { %v1302_v14 = vpop.f32.mrb[23].mxu1 }
 0x163   :  { %v1303_v15 = vadd.f32 %v1302_v14, %v1301_v11  ;;  %v966_v16 = vmax.f32 %v957_v12, 0.0  ;;  %v882_v17 = vadd.f32 %v1262_v13, %v802_v56 }
 0x165   :  { %969 = vst [vmem:[%s2507_s3 + $0x8] sm:$0xff] %v966_v16  ;;  %v962_v18 = vadd.f32 %v1303_v15, %v882_v17 }
 0x167   :  { %v967_v19 = vmax.f32 %v962_v18, 0.0 }
 0x169   :  { %970 = vst [vmem:[%s2507_s3 + $0x10] sm:$0xff] %v967_v19 }

// kernel: actor_forward.5
= control target key start
LH: loop header
LB: loop body
LE: loop exit
PB: predicated region body
PF: predicated region fallthrough
CT: control target
= control target key end

     0   :  { %vm1706_vm0 = vmmov 0   ;;  %vm1011_vm1 = vcmask 1043456   ;;  %vm1007_vm2 = vcmask 818176   ;;  %vm1086_vm3 = vcmask 31744   ;;  %s2676_s1 = inlined_call_operand.vmem [shape: f32[1152,128], index: 1, kind: input, shape index: {}]   ;;  %s2677_s0 = inlined_call_operand.vmem [shape: f32[8,1152], index: 0, kind: input, shape index: {}]   ;;  %s2678_s3 = inlined_call_operand.vmem [shape: f32[128,512], index: 3, kind: input, shape index: {}]   ;;  %s2679_s5 = inlined_call_operand.vmem [shape: f32[512,100], index: 5, kind: input, shape index: {}]   ;;  %s2680_s2 = inlined_call_operand.vmem [shape: f32[1,128], index: 2, kind: input, shape index: {}]   ;;  %s2681_s4 = inlined_call_operand.vmem [shape: f32[1,512], index: 4, kind: input, shape index: {}]   ;;  %s2682_s7 = inlined_call_operand.vmem [shape: f32[100,4], index: 7, kind: input, shape index: {}]   ;;  %s2683_s6 = inlined_call_operand.vmem [shape: f32[1,100], index: 6, kind: input, shape index: {}]   ;;  %s2684_s8 = inlined_call_operand.vmem [shape: f32[1,4], index: 8, kind: input, shape index: {}]   ;;  %s2685_s9 = inlined_call_operand.vmem [shape: f32[8,4], index: 9, kind: output, shape index: {}]  }
   0x1   :  { %v57_v0 = vld [vmem:[%s2676_s1 + $0x80] sm:$0xff]  ;;  %v58_v1 = vld [vmem:[%s2676_s1 + $0x88] sm:$0xff]  ;;  %v59_v11 = vld [vmem:[%s2676_s1 + $0x90] sm:$0xff] }
   0x2   :  { %v41_v2 = vld [vmem:[%s2676_s1] sm:$0xff]  ;;  %v1402_v3 = vpack.c.bf16 %v58_v1, %v57_v0  ;;  %v42_v4 = vld [vmem:[%s2676_s1 + $0x8] sm:$0xff]  ;;  %v60_v13 = vld [vmem:[%s2676_s1 + $0x98] sm:$0xff] }
   0x3   :  { %v89_v5 = vld [vmem:[%s2676_s1 + $0x180] sm:$0xff]  ;;  %v90_v6 = vld [vmem:[%s2676_s1 + $0x188] sm:$0xff]  ;;  %v1404_v7 = vpack.c.bf16 %v42_v4, %v41_v2  ;;  %v43_v14 = vld [vmem:[%s2676_s1 + $0x10] sm:$0xff]  ;;  %v1406_v16 = vpack.c.bf16 %v60_v13, %v59_v11 }
   0x4   :  { %v1434_v8 = vpack.c.bf16 %v90_v6, %v89_v5  ;;  %v73_v9 = vld [vmem:[%s2676_s1 + $0x100] sm:$0xff]  ;;  %v74_v10 = vld [vmem:[%s2676_s1 + $0x108] sm:$0xff]  ;;  %1403 = vmatprep.subr.bf16.mxu0 %v1402_v3  ;;  %v44_v15 = vld [vmem:[%s2676_s1 + $0x18] sm:$0xff] }
   0x5   :  { %v1436_v12 = vpack.c.bf16 %v74_v10, %v73_v9  ;;  %1405 = vmatpush3.bf16.msra.mxu0 %v1404_v7  ;;  %v1408_v17 = vpack.c.bf16 %v44_v15, %v43_v14  ;;  %v91_v18 = vld [vmem:[%s2676_s1 + $0x190] sm:$0xff]  ;;  %v92_v19 = vld [vmem:[%s2676_s1 + $0x198] sm:$0xff]  ;;  %v61_v23 = vld [vmem:[%s2676_s1 + $0xa0] sm:$0xff] }
   0x6   :  { %1435 = vmatprep.subr.bf16.mxu1 %v1434_v8  ;;  %v75_v20 = vld [vmem:[%s2676_s1 + $0x110] sm:$0xff]  ;;  %v1438_v21 = vpack.c.bf16 %v92_v19, %v91_v18  ;;  %v76_v22 = vld [vmem:[%s2676_s1 + $0x118] sm:$0xff]  ;;  %v62_v24 = vld [vmem:[%s2676_s1 + $0xa8] sm:$0xff]  ;;  %1407 = vmatprep.subr.bf16.mxu0 %v1406_v16 }
   0x7   :  { %1437 = vmatpush3.bf16.msra.mxu1 %v1436_v12  ;;  %v1440_v25 = vpack.c.bf16 %v76_v22, %v75_v20  ;;  %v1410_v26 = vpack.c.bf16 %v62_v24, %v61_v23  ;;  %v45_v27 = vld [vmem:[%s2676_s1 + $0x20] sm:$0xff]  ;;  %v46_v28 = vld [vmem:[%s2676_s1 + $0x28] sm:$0xff]  ;;  %v63_v35 = vld [vmem:[%s2676_s1 + $0xb0] sm:$0xff] }
   0x8   :  { %v93_v29 = vld [vmem:[%s2676_s1 + $0x1a0] sm:$0xff]  ;;  %1439 = vmatprep.subr.bf16.mxu1 %v1438_v21  ;;  %v94_v30 = vld [vmem:[%s2676_s1 + $0x1a8] sm:$0xff]  ;;  %v1412_v33 = vpack.c.bf16 %v46_v28, %v45_v27  ;;  %v64_v36 = vld [vmem:[%s2676_s1 + $0xb8] sm:$0xff] }
   0x9   :  { %v77_v31 = vld [vmem:[%s2676_s1 + $0x120] sm:$0xff]  ;;  %v78_v32 = vld [vmem:[%s2676_s1 + $0x128] sm:$0xff]  ;;  %1409 = vmatpush3.bf16.msra.mxu0 %v1408_v17  ;;  %v1442_v34 = vpack.c.bf16 %v94_v30, %v93_v29  ;;  %v47_v37 = vld [vmem:[%s2676_s1 + $0x30] sm:$0xff]  ;;  %v1414_v39 = vpack.c.bf16 %v64_v36, %v63_v35 }
   0xa   :  { %1411 = vmatprep.subr.bf16.mxu0 %v1410_v26  ;;  %v1444_v38 = vpack.c.bf16 %v78_v32, %v77_v31  ;;  %v48_v40 = vld [vmem:[%s2676_s1 + $0x38] sm:$0xff]  ;;  %v95_v41 = vld [vmem:[%s2676_s1 + $0x1b0] sm:$0xff]  ;;  %v65_v46 = vld [vmem:[%s2676_s1 + $0xc0] sm:$0xff] }
   0xb   :  { %1441 = vmatpush3.bf16.msra.mxu1 %v1440_v25  ;;  %v96_v42 = vld [vmem:[%s2676_s1 + $0x1b8] sm:$0xff]  ;;  %v79_v44 = vld [vmem:[%s2676_s1 + $0x130] sm:$0xff]  ;;  %v66_v47 = vld [vmem:[%s2676_s1 + $0xc8] sm:$0xff]  ;;  %v1416_v48 = vpack.c.bf16 %v48_v40, %v47_v37 }
   0xc   :  { %1443 = vmatprep.subr.bf16.mxu1 %v1442_v34  ;;  %v1446_v43 = vpack.c.bf16 %v96_v42, %v95_v41  ;;  %v80_v45 = vld [vmem:[%s2676_s1 + $0x138] sm:$0xff]  ;;  %v97_v49 = vld [vmem:[%s2676_s1 + $0x1c0] sm:$0xff]  ;;  %v98_v50 = vld [vmem:[%s2676_s1 + $0x1c8] sm:$0xff]  ;;  %v1418_v52 = vpack.c.bf16 %v66_v47, %v65_v46 }
   0xd   :  { %1413 = vmatpush3.bf16.msra.mxu0 %v1412_v33  ;;  %v1448_v51 = vpack.c.bf16 %v80_v45, %v79_v44  ;;  %v49_v53 = vld [vmem:[%s2676_s1 + $0x40] sm:$0xff]  ;;  %v50_v54 = vld [vmem:[%s2676_s1 + $0x48] sm:$0xff]  ;;  %v1450_v56 = vpack.c.bf16 %v98_v50, %v97_v49  ;;  %v67_v58 = vld [vmem:[%s2676_s1 + $0xd0] sm:$0xff] }
   0xe   :  { %1415 = vmatprep.subr.bf16.mxu0 %v1414_v39  ;;  %v81_v55 = vld [vmem:[%s2676_s1 + $0x140] sm:$0xff]  ;;  %v82_v57 = vld [vmem:[%s2676_s1 + $0x148] sm:$0xff]  ;;  %v68_v59 = vld [vmem:[%s2676_s1 + $0xd8] sm:$0xff]  ;;  %v1420_v62 = vpack.c.bf16 %v50_v54, %v49_v53 }
   0xf   :  { %1445 = vmatpush3.bf16.msra.mxu1 %v1444_v38  ;;  %v99_v60 = vld [vmem:[%s2676_s1 + $0x1d0] sm:$0xff]  ;;  %v100_v61 = vld [vmem:[%s2676_s1 + $0x1d8] sm:$0xff]  ;;  %v1452_v63 = vpack.c.bf16 %v82_v57, %v81_v55  ;;  %v1422_v0 = vpack.c.bf16 %v68_v59, %v67_v58  ;;  %v69_v6 = vld [vmem:[%s2676_s1 + $0xe0] sm:$0xff] }
  0x10   :  { %1447 = vmatprep.subr.bf16.mxu1 %v1446_v43  ;;  %v51_v1 = vld [vmem:[%s2676_s1 + $0x50] sm:$0xff]  ;;  %v52_v2 = vld [vmem:[%s2676_s1 + $0x58] sm:$0xff]  ;;  %v1454_v4 = vpack.c.bf16 %v100_v61, %v99_v60  ;;  %v70_v7 = vld [vmem:[%s2676_s1 + $0xe8] sm:$0xff] }
  0x11   :  { %1417 = vmatpush3.bf16.msra.mxu0 %v1416_v48  ;;  %v83_v3 = vld [vmem:[%s2676_s1 + $0x150] sm:$0xff]  ;;  %v84_v5 = vld [vmem:[%s2676_s1 + $0x158] sm:$0xff]  ;;  %v101_v8 = vld [vmem:[%s2676_s1 + $0x1e0] sm:$0xff]  ;;  %v1424_v10 = vpack.c.bf16 %v52_v2, %v51_v1  ;;  %v1426_v14 = vpack.c.bf16 %v70_v7, %v69_v6 }
  0x12   :  { %1419 = vmatprep.subr.bf16.mxu0 %v1418_v52  ;;  %v102_v9 = vld [vmem:[%s2676_s1 + $0x1e8] sm:$0xff]  ;;  %v53_v11 = vld [vmem:[%s2676_s1 + $0x60] sm:$0xff]  ;;  %v1456_v13 = vpack.c.bf16 %v84_v5, %v83_v3  ;;  %v71_v19 = vld [vmem:[%s2676_s1 + $0xf0] sm:$0xff] }
  0x13   :  { %1449 = vmatpush3.bf16.msra.mxu1 %v1448_v51  ;;  %v33_v12 = vld [vmem:[%s2677_s0 + $0x8] sm:$0xff]  ;;  %v85_v16 = vld [vmem:[%s2676_s1 + $0x160] sm:$0xff]  ;;  %v1458_v18 = vpack.c.bf16 %v102_v9, %v101_v8  ;;  %v72_v20 = vld [vmem:[%s2676_s1 + $0xf8] sm:$0xff] }
  0x14   :  { %1451 = vmatprep.subr.bf16.mxu1 %v1450_v56  ;;  %v54_v15 = vld [vmem:[%s2676_s1 + $0x68] sm:$0xff]  ;;  %256 = vmatprep.mubr.f32.mxu0 %v33_v12  ;;  %v35_v21 = vld [vmem:[%s2677_s0 + $0x18] sm:$0xff]  ;;  %v103_v22 = vld [vmem:[%s2676_s1 + $0x1f0] sm:$0xff]  ;;  %v1430_v26 = vpack.c.bf16 %v72_v20, %v71_v19 }
  0x15   :  { %1421 = vmatpush3.bf16.msra.mxu0 %v1420_v62  ;;  %v86_v17 = vld [vmem:[%s2676_s1 + $0x168] sm:$0xff]  ;;  %v104_v23 = vld [vmem:[%s2676_s1 + $0x1f8] sm:$0xff]  ;;  %326 = vmatprep.mubr.f32.mxu1 %v35_v21  ;;  %v1428_v24 = vpack.c.bf16 %v54_v15, %v53_v11  ;;  %v55_v27 = vld [vmem:[%s2676_s1 + $0x70] sm:$0xff] }
  0x16   :  { %1423 = vmatprep.subr.bf16.mxu0 %v1422_v0  ;;  %v1460_v25 = vpack.c.bf16 %v86_v17, %v85_v16  ;;  %v56_v28 = vld [vmem:[%s2676_s1 + $0x78] sm:$0xff]  ;;  %v87_v29 = vld [vmem:[%s2676_s1 + $0x170] sm:$0xff]  ;;  %v1462_v30 = vpack.c.bf16 %v104_v23, %v103_v22  ;;  %v121_v32 = vld [vmem:[%s2676_s1 + $0x280] sm:$0xff] }
  0x17   :  { %1453 = vmatpush3.bf16.msra.mxu1 %v1452_v63  ;;  %v88_v31 = vld [vmem:[%s2676_s1 + $0x178] sm:$0xff]  ;;  %v122_v33 = vld [vmem:[%s2676_s1 + $0x288] sm:$0xff]  ;;  %v153_v34 = vld [vmem:[%s2676_s1 + $0x380] sm:$0xff]  ;;  %v1432_v36 = vpack.c.bf16 %v56_v28, %v55_v27 }
  0x18   :  { %1455 = vmatprep.subr.bf16.mxu1 %v1454_v4  ;;  %v154_v35 = vld [vmem:[%s2676_s1 + $0x388] sm:$0xff]  ;;  %v1464_v37 = vpack.c.bf16 %v88_v31, %v87_v29  ;;  %v1466_v38 = vpack.c.bf16 %v122_v33, %v121_v32  ;;  %v105_v39 = vld [vmem:[%s2676_s1 + $0x200] sm:$0xff]  ;;  %v123_v44 = vld [vmem:[%s2676_s1 + $0x290] sm:$0xff] }
  0x19   :  { %1425 = vmatpush3.bf16.msra.mxu0 %v1424_v10  ;;  %v106_v40 = vld [vmem:[%s2676_s1 + $0x208] sm:$0xff]  ;;  %v137_v41 = vld [vmem:[%s2676_s1 + $0x300] sm:$0xff]  ;;  %v1498_v42 = vpack.c.bf16 %v154_v35, %v153_v34  ;;  %v124_v45 = vld [vmem:[%s2676_s1 + $0x298] sm:$0xff] }
  0x1a   :  { %1427 = vmatprep.subr.bf16.mxu0 %v1426_v14  ;;  %v138_v43 = vld [vmem:[%s2676_s1 + $0x308] sm:$0xff]  ;;  %v155_v46 = vld [vmem:[%s2676_s1 + $0x390] sm:$0xff]  ;;  %v156_v47 = vld [vmem:[%s2676_s1 + $0x398] sm:$0xff]  ;;  %v1468_v49 = vpack.c.bf16 %v106_v40, %v105_v39  ;;  %v1470_v52 = vpack.c.bf16 %v124_v45, %v123_v44 }
  0x1b   :  { %1457 = vmatpush3.bf16.msra.mxu1 %v1456_v13  ;;  %v32_v48 = vld [vmem:[%s2677_s0] sm:$0xff]  ;;  %v34_v50 = vld [vmem:[%s2677_s0 + $0x10] sm:$0xff]  ;;  %v1500_v51 = vpack.c.bf16 %v138_v43, %v137_v41  ;;  %v108_v54 = vld [vmem:[%s2676_s1 + $0x218] sm:$0xff]  ;;  %v1502_v56 = vpack.c.bf16 %v156_v47, %v155_v46 }
  0x1c   :  { %1459 = vmatprep.subr.bf16.mxu1 %v1458_v18  ;;  %v107_v53 = vld [vmem:[%s2676_s1 + $0x210] sm:$0xff]  ;;  %v140_v57 = vld [vmem:[%s2676_s1 + $0x318] sm:$0xff]  ;;  %v125_v58 = vld [vmem:[%s2676_s1 + $0x2a0] sm:$0xff] }
  0x1d   :  { %1429 = vmatpush3.bf16.msra.mxu0 %v1428_v24  ;;  %v139_v55 = vld [vmem:[%s2676_s1 + $0x310] sm:$0xff]  ;;  %v126_v59 = vld [vmem:[%s2676_s1 + $0x2a8] sm:$0xff]  ;;  %v157_v60 = vld [vmem:[%s2676_s1 + $0x3a0] sm:$0xff]  ;;  %v1472_v62 = vpack.c.bf16 %v108_v54, %v107_v53 }
  0x1e   :  { %1431 = vmatprep.subr.bf16.mxu0 %v1430_v26  ;;  %v158_v61 = vld [vmem:[%s2676_s1 + $0x3a8] sm:$0xff]  ;;  %v1504_v63 = vpack.c.bf16 %v140_v57, %v139_v55  ;;  %v1474_v0 = vpack.c.bf16 %v126_v59, %v125_v58  ;;  %v109_v1 = vld [vmem:[%s2676_s1 + $0x220] sm:$0xff]  ;;  %v127_v6 = vld [vmem:[%s2676_s1 + $0x2b0] sm:$0xff] }
  0x1f   :  { %1461 = vmatpush3.bf16.msra.mxu1 %v1460_v25  ;;  %v110_v2 = vld [vmem:[%s2676_s1 + $0x228] sm:$0xff]  ;;  %v141_v3 = vld [vmem:[%s2676_s1 + $0x320] sm:$0xff]  ;;  %v1506_v4 = vpack.c.bf16 %v158_v61, %v157_v60  ;;  %v128_v7 = vld [vmem:[%s2676_s1 + $0x2b8] sm:$0xff] }
  0x20   :  { %1463 = vmatprep.subr.bf16.mxu1 %v1462_v30  ;;  %v142_v5 = vld [vmem:[%s2676_s1 + $0x328] sm:$0xff]  ;;  %v159_v8 = vld [vmem:[%s2676_s1 + $0x3b0] sm:$0xff]  ;;  %v160_v9 = vld [vmem:[%s2676_s1 + $0x3b8] sm:$0xff]  ;;  %v1476_v10 = vpack.c.bf16 %v110_v2, %v109_v1  ;;  %v1478_v12 = vpack.c.bf16 %v128_v7, %v127_v6 }
  0x21   :  { %1433 = vmatpush3.bf16.msra.mxu0 %v1432_v36  ;;  %v1508_v11 = vpack.c.bf16 %v142_v5, %v141_v3  ;;  %v111_v13 = vld [vmem:[%s2676_s1 + $0x230] sm:$0xff]  ;;  %v112_v14 = vld [vmem:[%s2676_s1 + $0x238] sm:$0xff]  ;;  %v1510_v16 = vpack.c.bf16 %v160_v9, %v159_v8  ;;  %v129_v18 = vld [vmem:[%s2676_s1 + $0x2c0] sm:$0xff] }
  0x22   :  { %1467 = vmatprep.subr.bf16.mxu0 %v1466_v38  ;;  %v143_v15 = vld [vmem:[%s2676_s1 + $0x330] sm:$0xff]  ;;  %v144_v17 = vld [vmem:[%s2676_s1 + $0x338] sm:$0xff]  ;;  %v130_v19 = vld [vmem:[%s2676_s1 + $0x2c8] sm:$0xff]  ;;  %v1480_v23 = vpack.c.bf16 %v112_v14, %v111_v13 }
  0x23   :  { %1465 = vmatpush3.bf16.msra.mxu1 %v1464_v37  ;;  %v161_v20 = vld [vmem:[%s2676_s1 + $0x3c0] sm:$0xff]  ;;  %v162_v21 = vld [vmem:[%s2676_s1 + $0x3c8] sm:$0xff]  ;;  %v39_v24 = vld [vmem:[%s2677_s0 + $0x38] sm:$0xff]  ;;  %v1512_v25 = vpack.c.bf16 %v144_v17, %v143_v15  ;;  %v1482_v26 = vpack.c.bf16 %v130_v19, %v129_v18  ;;  %v1707_v17 = vmov 0.0  }
  0x24   :  { %1499 = vmatprep.subr.bf16.mxu1 %v1498_v42  ;;  %257 = vmatmul.mubr.f32.vlgmr.msra.gmra.mrb[0].mxu0 %v32_v48  ;;  %v37_v22 = vld [vmem:[%s2677_s0 + $0x28] sm:$0xff]  ;;  %v113_v27 = vld [vmem:[%s2676_s1 + $0x240] sm:$0xff]  ;;  %v1514_v30 = vpack.c.bf16 %v162_v21, %v161_v20  ;;  %v131_v32 = vld [vmem:[%s2676_s1 + $0x2d0] sm:$0xff] }
  0x25   :  { %1469 = vmatpush3.bf16.msra.mxu0 %v1468_v49  ;;  %396 = vmatprep.mubr.f32.mxu0 %v37_v22  ;;  %v114_v28 = vld [vmem:[%s2676_s1 + $0x248] sm:$0xff]  ;;  %v145_v29 = vld [vmem:[%s2676_s1 + $0x340] sm:$0xff]  ;;  %v132_v33 = vld [vmem:[%s2676_s1 + $0x2d8] sm:$0xff] }
  0x26   :  { %327 = vmatmul.mubr.f32.vlgmr.msra.gmra.mrb[0].mxu1 %v34_v50  ;;  %1471 = vmatprep.subr.bf16.mxu0 %v1470_v52  ;;  %v146_v31 = vld [vmem:[%s2676_s1 + $0x348] sm:$0xff]  ;;  %v163_v34 = vld [vmem:[%s2676_s1 + $0x3d0] sm:$0xff]  ;;  %v164_v35 = vld [vmem:[%s2676_s1 + $0x3d8] sm:$0xff]  ;;  %v1484_v36 = vpack.c.bf16 %v114_v28, %v113_v27  ;;  %v1486_v38 = vpack.c.bf16 %v132_v33, %v131_v32 }
  0x27   :  { %1501 = vmatpush3.bf16.msra.mxu1 %v1500_v51  ;;  %466 = vmatprep.mubr.f32.mxu1 %v39_v24  ;;  %v1516_v37 = vpack.c.bf16 %v146_v31, %v145_v29  ;;  %v115_v39 = vld [vmem:[%s2676_s1 + $0x250] sm:$0xff]  ;;  %v116_v40 = vld [vmem:[%s2676_s1 + $0x258] sm:$0xff]  ;;  %v1518_v42 = vpack.c.bf16 %v164_v35, %v163_v34  ;;  %v133_v44 = vld [vmem:[%s2676_s1 + $0x2e0] sm:$0xff] }
  0x28   :  { %1503 = vmatprep.subr.bf16.mxu1 %v1502_v56  ;;  %v147_v41 = vld [vmem:[%s2676_s1 + $0x350] sm:$0xff]  ;;  %v148_v43 = vld [vmem:[%s2676_s1 + $0x358] sm:$0xff]  ;;  %v134_v45 = vld [vmem:[%s2676_s1 + $0x2e8] sm:$0xff]  ;;  %v1488_v48 = vpack.c.bf16 %v116_v40, %v115_v39 }
  0x29   :  { %1473 = vmatpush3.bf16.msra.mxu0 %v1472_v62  ;;  %v165_v46 = vld [vmem:[%s2676_s1 + $0x3e0] sm:$0xff]  ;;  %v166_v47 = vld [vmem:[%s2676_s1 + $0x3e8] sm:$0xff]  ;;  %v1520_v49 = vpack.c.bf16 %v148_v43, %v147_v41  ;;  %v1490_v50 = vpack.c.bf16 %v134_v45, %v133_v44  ;;  %v135_v56 = vld [vmem:[%s2676_s1 + $0x2f0] sm:$0xff] }
  0x2a   :  { %1475 = vmatprep.subr.bf16.mxu0 %v1474_v0  ;;  %v117_v51 = vld [vmem:[%s2676_s1 + $0x260] sm:$0xff]  ;;  %v118_v52 = vld [vmem:[%s2676_s1 + $0x268] sm:$0xff]  ;;  %v1522_v54 = vpack.c.bf16 %v166_v47, %v165_v46  ;;  %v136_v57 = vld [vmem:[%s2676_s1 + $0x2f8] sm:$0xff] }
  0x2b   :  { %1505 = vmatpush3.bf16.msra.mxu1 %v1504_v63  ;;  %v149_v53 = vld [vmem:[%s2676_s1 + $0x360] sm:$0xff]  ;;  %v150_v55 = vld [vmem:[%s2676_s1 + $0x368] sm:$0xff]  ;;  %v167_v58 = vld [vmem:[%s2676_s1 + $0x3f0] sm:$0xff]  ;;  %v1492_v60 = vpack.c.bf16 %v118_v52, %v117_v51  ;;  %v1494_v62 = vpack.c.bf16 %v136_v57, %v135_v56 }
  0x2c   :  { %1507 = vmatprep.subr.bf16.mxu1 %v1506_v4  ;;  %v168_v59 = vld [vmem:[%s2676_s1 + $0x3f8] sm:$0xff]  ;;  %v1524_v61 = vpack.c.bf16 %v150_v55, %v149_v53  ;;  %v119_v63 = vld [vmem:[%s2676_s1 + $0x270] sm:$0xff]  ;;  %v169_v6 = vld [vmem:[%s2676_s1 + $0x400] sm:$0xff] }
  0x2d   :  { %1477 = vmatpush3.bf16.msra.mxu0 %v1476_v10  ;;  %v120_v0 = vld [vmem:[%s2676_s1 + $0x278] sm:$0xff]  ;;  %v1526_v1 = vpack.c.bf16 %v168_v59, %v167_v58  ;;  %v151_v2 = vld [vmem:[%s2676_s1 + $0x370] sm:$0xff]  ;;  %v170_v7 = vld [vmem:[%s2676_s1 + $0x408] sm:$0xff]  ;;  %v1705_v10 = vmov 0.0|0.0  }
  0x2e   :  { %1479 = vmatprep.subr.bf16.mxu0 %v1478_v12  ;;  %v152_v3 = vld [vmem:[%s2676_s1 + $0x378] sm:$0xff]  ;;  %v1496_v4 = vpack.c.bf16 %v120_v0, %v119_v63  ;;  %v36_v8 = vld [vmem:[%s2677_s0 + $0x20] sm:$0xff]  ;;  %v1531_v9 = vpack.c.bf16 %v170_v7, %v169_v6  ;;  %v171_v12 = vld [vmem:[%s2676_s1 + $0x410] sm:$0xff] }
  0x2f   :  { %1509 = vmatpush3.bf16.msra.mxu1 %v1508_v11  ;;  %v1528_v5 = vpack.c.bf16 %v152_v3, %v151_v2  ;;  %v38_v11 = vld [vmem:[%s2677_s0 + $0x30] sm:$0xff]  ;;  %v172_v13 = vld [vmem:[%s2676_s1 + $0x418] sm:$0xff]  ;;  %v173_v15 = vld [vmem:[%s2676_s1 + $0x420] sm:$0xff] }
  0x30   :  { %1511 = vmatprep.subr.bf16.mxu1 %v1510_v16  ;;  %v1534_v14 = vpack.c.bf16 %v172_v13, %v171_v12  ;;  %v174_v16 = vld [vmem:[%s2676_s1 + $0x428] sm:$0xff]  ;;  %v175_v19 = vld [vmem:[%s2676_s1 + $0x430] sm:$0xff]  ;;  %v176_v20 = vld [vmem:[%s2676_s1 + $0x438] sm:$0xff] }
  0x31   :  { %1481 = vmatpush3.bf16.msra.mxu0 %v1480_v23  ;;  %v1537_v18 = vpack.c.bf16 %v174_v16, %v173_v15  ;;  %v1540_v21 = vpack.c.bf16 %v176_v20, %v175_v19  ;;  %v177_v22 = vld [vmem:[%s2676_s1 + $0x440] sm:$0xff]  ;;  %v178_v23 = vld [vmem:[%s2676_s1 + $0x448] sm:$0xff]  ;;  %v183_v31 = vld [vmem:[%s2676_s1 + $0x470] sm:$0xff] }
  0x32   :  { %1483 = vmatprep.subr.bf16.mxu0 %v1482_v26  ;;  %v1543_v24 = vpack.c.bf16 %v178_v23, %v177_v22  ;;  %v180_v26 = vld [vmem:[%s2676_s1 + $0x458] sm:$0xff]  ;;  %v181_v28 = vld [vmem:[%s2676_s1 + $0x460] sm:$0xff]  ;;  %v182_v29 = vld [vmem:[%s2676_s1 + $0x468] sm:$0xff] }
  0x33   :  { %1513 = vmatpush3.bf16.msra.mxu1 %v1512_v25  ;;  %v179_v25 = vld [vmem:[%s2676_s1 + $0x450] sm:$0xff]  ;;  %v184_v32 = vld [vmem:[%s2676_s1 + $0x478] sm:$0xff]  ;;  %v40_v34 = vld [vmem:[%s2677_s0 + $0x40] sm:$0xff] }
  0x34   :  { %1515 = vmatprep.subr.bf16.mxu1 %v1514_v30  ;;  %v1546_v27 = vpack.c.bf16 %v180_v26, %v179_v25  ;;  %v1549_v30 = vpack.c.bf16 %v182_v29, %v181_v28  ;;  %v1552_v33 = vpack.c.bf16 %v184_v32, %v183_v31  ;;  %v544_v35 = vld [vmem:[%s2678_s3 + $0x8] sm:$0xff]  ;;  %v550_v39 = vld [vmem:[%s2678_s3 + $0x38] sm:$0xff]  ;;  %v543_v40 = vld [vmem:[%s2678_s3] sm:$0xff] }
  0x35   :  { %1485 = vmatpush3.bf16.msra.mxu0 %v1484_v36  ;;  %v548_v36 = vld [vmem:[%s2678_s3 + $0x28] sm:$0xff]  ;;  %v547_v41 = vld [vmem:[%s2678_s3 + $0x20] sm:$0xff]  ;;  %v545_v44 = vld [vmem:[%s2678_s3 + $0x10] sm:$0xff] }
  0x36   :  { %1487 = vmatprep.subr.bf16.mxu0 %v1486_v38  ;;  %v1554_v38 = vpack.c.bf16 %v548_v36, %v544_v35  ;;  %v1556_v43 = vpack.c.bf16 %v547_v41, %v543_v40  ;;  %v549_v45 = vld [vmem:[%s2678_s3 + $0x30] sm:$0xff]  ;;  %v552_v46 = vld [vmem:[%s2678_s3 + $0x48] sm:$0xff]  ;;  %v551_v53 = vld [vmem:[%s2678_s3 + $0x40] sm:$0xff] }
  0x37   :  { %1517 = vmatpush3.bf16.msra.mxu1 %v1516_v37  ;;  %v546_v37 = vld [vmem:[%s2678_s3 + $0x18] sm:$0xff]  ;;  %v1588_v47 = vpack.c.bf16 %v549_v45, %v545_v44  ;;  %v553_v55 = vld [vmem:[%s2678_s3 + $0x50] sm:$0xff]  ;;  %v560_v58 = vld [vmem:[%s2678_s3 + $0x88] sm:$0xff] }
  0x38   :  { %1519 = vmatprep.subr.bf16.mxu1 %v1518_v42  ;;  %v1586_v42 = vpack.c.bf16 %v550_v39, %v546_v37  ;;  %v557_v57 = vld [vmem:[%s2678_s3 + $0x70] sm:$0xff]  ;;  %v564_v59 = vld [vmem:[%s2678_s3 + $0xa8] sm:$0xff]  ;;  %v566_v63 = vld [vmem:[%s2678_s3 + $0xb8] sm:$0xff] }
  0x39   :  { %1489 = vmatpush3.bf16.msra.mxu0 %v1488_v48  ;;  %v556_v48 = vld [vmem:[%s2678_s3 + $0x68] sm:$0xff]  ;;  %v559_v0 = vld [vmem:[%s2678_s3 + $0x80] sm:$0xff]  ;;  %v561_v3 = vld [vmem:[%s2678_s3 + $0x90] sm:$0xff] }
  0x3a   :  { %1491 = vmatprep.subr.bf16.mxu0 %v1490_v50  ;;  %v558_v50 = vld [vmem:[%s2678_s3 + $0x78] sm:$0xff]  ;;  %v1558_v51 = vpack.c.bf16 %v556_v48, %v552_v46  ;;  %v563_v2 = vld [vmem:[%s2678_s3 + $0xa0] sm:$0xff]  ;;  %v568_v6 = vld [vmem:[%s2678_s3 + $0xc8] sm:$0xff] }
  0x3b   :  { %1521 = vmatpush3.bf16.msra.mxu1 %v1520_v49  ;;  %v554_v49 = vld [vmem:[%s2678_s3 + $0x58] sm:$0xff]  ;;  %v572_v7 = vld [vmem:[%s2678_s3 + $0xe8] sm:$0xff]  ;;  %v567_v13 = vld [vmem:[%s2678_s3 + $0xc0] sm:$0xff] }
  0x3c   :  { %1523 = vmatprep.subr.bf16.mxu1 %v1522_v54  ;;  %v1590_v52 = vpack.c.bf16 %v558_v50, %v554_v49  ;;  %v555_v54 = vld [vmem:[%s2678_s3 + $0x60] sm:$0xff]  ;;  %v574_v12 = vld [vmem:[%s2678_s3 + $0xf8] sm:$0xff]  ;;  %v569_v16 = vld [vmem:[%s2678_s3 + $0xd0] sm:$0xff] }
  0x3d   :  { %1493 = vmatpush3.bf16.msra.mxu0 %v1492_v60  ;;  %v1560_v56 = vpack.c.bf16 %v555_v54, %v551_v53  ;;  %v1592_v60 = vpack.c.bf16 %v557_v57, %v553_v55  ;;  %v576_v19 = vld [vmem:[%s2678_s3 + $0x108] sm:$0xff]  ;;  %v582_v22 = vld [vmem:[%s2678_s3 + $0x138] sm:$0xff]  ;;  %v575_v26 = vld [vmem:[%s2678_s3 + $0x100] sm:$0xff] }
  0x3e   :  { %1495 = vmatprep.subr.bf16.mxu0 %v1494_v62  ;;  %v562_v62 = vld [vmem:[%s2678_s3 + $0x98] sm:$0xff]  ;;  %v580_v20 = vld [vmem:[%s2678_s3 + $0x128] sm:$0xff]  ;;  %v577_v28 = vld [vmem:[%s2678_s3 + $0x110] sm:$0xff] }
  0x3f   :  { %1525 = vmatpush3.bf16.msra.mxu1 %v1524_v61  ;;  %v1562_v61 = vpack.c.bf16 %v564_v59, %v560_v58  ;;  %v1570_v25 = vpack.c.bf16 %v580_v20, %v576_v19  ;;  %v584_v31 = vld [vmem:[%s2678_s3 + $0x148] sm:$0xff]  ;;  %v587_v39 = vld [vmem:[%s2678_s3 + $0x160] sm:$0xff]  ;;  %v585_v40 = vld [vmem:[%s2678_s3 + $0x150] sm:$0xff] }
  0x40   :  { %1527 = vmatprep.subr.bf16.mxu1 %v1526_v1  ;;  %v1594_v1 = vpack.c.bf16 %v566_v63, %v562_v62  ;;  %v588_v32 = vld [vmem:[%s2678_s3 + $0x168] sm:$0xff]  ;;  %v594_v45 = vld [vmem:[%s2678_s3 + $0x198] sm:$0xff]  ;;  %v591_v50 = vld [vmem:[%s2678_s3 + $0x180] sm:$0xff] }
  0x41   :  { %1497 = vmatpush3.bf16.msra.mxu0 %v1496_v4  ;;  %v565_v4 = vld [vmem:[%s2678_s3 + $0xb0] sm:$0xff]  ;;  %v1574_v37 = vpack.c.bf16 %v588_v32, %v584_v31  ;;  %v596_v44 = vld [vmem:[%s2678_s3 + $0x1a8] sm:$0xff]  ;;  %v598_v46 = vld [vmem:[%s2678_s3 + $0x1b8] sm:$0xff] }
  0x42   :  { %1530 = vmatprep.subr.bf16.mxu0 %v1705_v10  ;;  %v593_v53 = vld [vmem:[%s2678_s3 + $0x190] sm:$0xff]  ;;  %v600_v57 = vld [vmem:[%s2678_s3 + $0x1c8] sm:$0xff]  ;;  %v602_v59 = vld [vmem:[%s2678_s3 + $0x1d8] sm:$0xff] }
  0x43   :  { %1529 = vmatpush3.bf16.msra.mxu1 %v1528_v5  ;;  %v1564_v5 = vpack.c.bf16 %v563_v2, %v559_v0  ;;  %v597_v54 = vld [vmem:[%s2678_s3 + $0x1b0] sm:$0xff]  ;;  %v604_v58 = vld [vmem:[%s2678_s3 + $0x1e8] sm:$0xff]  ;;  %v599_v62 = vld [vmem:[%s2678_s3 + $0x1c0] sm:$0xff] }
  0x44   :  { %397 = vmatmul.mubr.f32.vlgmr.msra.gmra.mrb[2].mxu0 %v36_v8  ;;  %1555 = vmatprep.subr.bf16.mxu1 %v1554_v38  ;;  %v570_v8 = vld [vmem:[%s2678_s3 + $0xd8] sm:$0xff]  ;;  %v583_v38 = vld [vmem:[%s2678_s3 + $0x140] sm:$0xff]  ;;  %v601_v2 = vld [vmem:[%s2678_s3 + $0x1d0] sm:$0xff] }
  0x45   :  { %1532 = vmatpush3.bf16.msra.mxu0 %v1531_v9  ;;  %1370 = vmatprep.mubr.msk.f32.mxu0 %vm1706_vm0, %v1707_v17  ;;  %v1596_v9 = vpack.c.bf16 %v565_v4, %v561_v3  ;;  %v1598_v15 = vpack.c.bf16 %v574_v12, %v570_v8  ;;  %v603_v63 = vld [vmem:[%s2678_s3 + $0x1e0] sm:$0xff]  ;;  %v605_v3 = vld [vmem:[%s2678_s3 + $0x1f0] sm:$0xff]  ;;  %v776_v31 = vld [vmem:[%s2679_s5 + $0x8] sm:$0xff] }
  0x46   :  { %467 = vmatmul.mubr.f32.vlgmr.msra.gmra.mrb[2].mxu1 %v38_v11  ;;  %1533 = vmatprep.subr.bf16.mxu0 %v1705_v10  ;;  %v1566_v11 = vpack.c.bf16 %v572_v7, %v568_v6  ;;  %v1616_v4 = vpack.c.bf16 %v605_v3, %v601_v2  ;;  %v792_v6 = vld [vmem:[%s2679_s5 + $0x88] sm:$0xff]  ;;  %v823_v7 = vld [vmem:[%s2679_s5 + $0x180] sm:$0xff] }
  0x47   :  { %693 = vmatprep.mubr.f32.mxu1 %v1707_v17  ;;  %1557 = vmatpush1.bf16.msra.mxu1 %v1556_v43  ;;  %v592_v43 = vld [vmem:[%s2678_s3 + $0x188] sm:$0xff]  ;;  %v807_v32 = vld [vmem:[%s2679_s5 + $0x100] sm:$0xff] }
  0x48   :  { %1559 = vmatprep.subr.bf16.mxu1 %v1558_v51  ;;  %v1578_v49 = vpack.c.bf16 %v596_v44, %v592_v43  ;;  %v595_v51 = vld [vmem:[%s2678_s3 + $0x1a0] sm:$0xff]  ;;  %v777_v43 = vld [vmem:[%s2679_s5 + $0x10] sm:$0xff]  ;;  %v778_v44 = vld [vmem:[%s2679_s5 + $0x18] sm:$0xff] }
  0x49   :  { %1535 = vmatpush3.bf16.msra.mxu0 %v1534_v14  ;;  %v571_v14 = vld [vmem:[%s2678_s3 + $0xe0] sm:$0xff]  ;;  %v1580_v55 = vpack.c.bf16 %v595_v51, %v591_v50  ;;  %v796_v51 = vld [vmem:[%s2679_s5 + $0xa8] sm:$0xff] }
  0x4a   :  { %1536 = vmatprep.subr.bf16.mxu0 %v1705_v10  ;;  %v1568_v23 = vpack.c.bf16 %v571_v14, %v567_v13  ;;  %v1092_v13 = vld [vmem:[%s2680_s2] ss:$0 sm:$0xff] }
  0x4b   :  { %1561 = vmatpush1.bf16.msra.mxu1 %v1560_v56  ;;  %v1612_v56 = vpack.c.bf16 %v597_v54, %v593_v53  ;;  %v795_v50 = vld [vmem:[%s2679_s5 + $0xa0] sm:$0xff]  ;;  %v828_v53 = vld [vmem:[%s2679_s5 + $0x1a8] sm:$0xff]  ;;  %v1624_v54 = vpack.c.bf16 %v778_v44, %v777_v43 }
  0x4c   :  { %1563 = vmatprep.subr.bf16.mxu1 %v1562_v61  ;;  %v606_v61 = vld [vmem:[%s2678_s3 + $0x1f8] sm:$0xff]  ;;  %v787_v44 = vld [vmem:[%s2679_s5 + $0x60] sm:$0xff] }
  0x4d   :  { %1538 = vmatpush3.bf16.msra.mxu0 %v1537_v18  ;;  %v573_v18 = vld [vmem:[%s2678_s3 + $0xf0] sm:$0xff]  ;;  %v1614_v0 = vpack.c.bf16 %v606_v61, %v602_v59  ;;  %v812_v61 = vld [vmem:[%s2679_s5 + $0x128] sm:$0xff] }
  0x4e   :  { %1539 = vmatprep.subr.bf16.mxu0 %v1705_v10 }
  0x4f   :  { %1565 = vmatpush1.bf16.msra.mxu1 %v1564_v5  ;;  %v791_v5 = vld [vmem:[%s2679_s5 + $0x80] sm:$0xff] }
  0x50   :  { %1567 = vmatprep.subr.bf16.mxu1 %v1566_v11  ;;  %v1618_v8 = vpack.c.bf16 %v792_v6, %v791_v5  ;;  %v782_v5 = vld [vmem:[%s2679_s5 + $0x38] sm:$0xff] }
  0x51   :  { %1541 = vmatpush3.bf16.msra.mxu0 %v1540_v21  ;;  %v578_v21 = vld [vmem:[%s2678_s3 + $0x118] sm:$0xff] }
  0x52   :  { %1542 = vmatprep.subr.bf16.mxu0 %v1705_v10  ;;  %v1602_v29 = vpack.c.bf16 %v582_v22, %v578_v21 }
  0x53   :  { %1569 = vmatpush1.bf16.msra.mxu1 %v1568_v23 }
  0x54   :  { %1571 = vmatprep.subr.bf16.mxu1 %v1570_v25 }
  0x55   :  { %1544 = vmatpush3.bf16.msra.mxu0 %v1543_v24  ;;  %v1600_v24 = vpack.c.bf16 %v573_v18, %v569_v16 }
  0x56   :  { %1545 = vmatprep.subr.bf16.mxu0 %v1705_v10 }
  0x59   :  { %1547 = vmatpush3.bf16.msra.mxu0 %v1546_v27  ;;  %v579_v27 = vld [vmem:[%s2678_s3 + $0x120] sm:$0xff] }
  0x5a   :  { %1548 = vmatprep.subr.bf16.mxu0 %v1705_v10  ;;  %v1572_v35 = vpack.c.bf16 %v579_v27, %v575_v26 }
  0x5c   :  { %1573 = vmatpush1.bf16.msra.mxu1 %v1572_v35 }
  0x5d   :  { %1550 = vmatpush3.bf16.msra.mxu0 %v1549_v30  ;;  %v581_v30 = vld [vmem:[%s2678_s3 + $0x130] sm:$0xff]  ;;  %1575 = vmatprep.subr.bf16.mxu1 %v1574_v37 }
  0x5e   :  { %1551 = vmatprep.subr.bf16.mxu0 %v1705_v10  ;;  %v1604_v36 = vpack.c.bf16 %v581_v30, %v577_v28  ;;  %v775_v30 = vld [vmem:[%s2679_s5] sm:$0xff]  ;;  %v825_v37 = vld [vmem:[%s2679_s5 + $0x190] sm:$0xff] }
  0x61   :  { %1553 = vmatpush3.bf16.msra.mxu0 %v1552_v33  ;;  %v586_v33 = vld [vmem:[%s2678_s3 + $0x158] sm:$0xff] }
  0x62   :  { %1587 = vmatprep.subr.bf16.mxu0 %v1586_v42  ;;  %v589_v42 = vld [vmem:[%s2678_s3 + $0x170] sm:$0xff] }
  0x63   :  { %v1608_v48 = vpack.c.bf16 %v589_v42, %v585_v40 }
  0x64   :  { %1371 = vmatmul.mubr.f32.vlgmr.msra.gmra.mrb[4].mxu0 %v40_v34  ;;  %v590_v34 = vld [vmem:[%s2678_s3 + $0x178] sm:$0xff] }
  0x65   :  { %764 = vmatprep.mubr.f32.mxu0 %v1707_v17  ;;  %1589 = vmatpush1.bf16.msra.mxu0 %v1588_v47  ;;  %v1606_v41 = vpack.c.bf16 %v590_v34, %v586_v33  ;;  %v1576_v47 = vpack.c.bf16 %v587_v39, %v583_v38  ;;  %v808_v33 = vld [vmem:[%s2679_s5 + $0x108] sm:$0xff]  ;;  %v793_v34 = vld [vmem:[%s2679_s5 + $0x90] sm:$0xff]  ;;  %v826_v38 = vld [vmem:[%s2679_s5 + $0x198] sm:$0xff] }
  0x66   :  { %1591 = vmatprep.subr.bf16.mxu0 %v1590_v52  ;;  %v1610_v52 = vpack.c.bf16 %v598_v46, %v594_v45  ;;  %v1652_v42 = vpack.c.bf16 %v808_v33, %v807_v32 }
  0x67   :  { %1577 = vmatpush1.bf16.msra.mxu1 %v1576_v47  ;;  %v1654_v47 = vpack.c.bf16 %v826_v38, %v825_v37  ;;  %v804_v37 = vld [vmem:[%s2679_s5 + $0xe8] sm:$0xff]  ;;  %v835_v38 = vld [vmem:[%s2679_s5 + $0x1e0] sm:$0xff] }
  0x68   :  { %1579 = vmatprep.subr.bf16.mxu1 %v1578_v49  ;;  %v810_v49 = vld [vmem:[%s2679_s5 + $0x118] sm:$0xff] }
  0x69   :  { %1593 = vmatpush1.bf16.msra.mxu0 %v1592_v60  ;;  %v1582_v60 = vpack.c.bf16 %v604_v58, %v600_v57  ;;  %v780_v57 = vld [vmem:[%s2679_s5 + $0x28] sm:$0xff]  ;;  %v1626_v58 = vpack.c.bf16 %v796_v51, %v795_v50  ;;  %v805_v50 = vld [vmem:[%s2679_s5 + $0xf0] sm:$0xff]  ;;  %v806_v51 = vld [vmem:[%s2679_s5 + $0xf8] sm:$0xff] }
  0x6a   :  { %1595 = vmatprep.subr.bf16.mxu0 %v1594_v1  ;;  %v1584_v1 = vpack.c.bf16 %v603_v63, %v599_v62  ;;  %v797_v62 = vld [vmem:[%s2679_s5 + $0xb0] sm:$0xff]  ;;  %v798_v63 = vld [vmem:[%s2679_s5 + $0xb8] sm:$0xff] }
  0x6b   :  { %1581 = vmatpush1.bf16.msra.mxu1 %v1580_v55  ;;  %v1630_v6 = vpack.c.bf16 %v798_v63, %v797_v62  ;;  %v609_v62 = vlaneseq }
  0x6c   :  { %1583 = vmatprep.subr.bf16.mxu1 %v1582_v60  ;;  %v811_v60 = vld [vmem:[%s2679_s5 + $0x120] sm:$0xff] }
  0x6d   :  { %1597 = vmatpush1.bf16.msra.mxu0 %v1596_v9  ;;  %v824_v9 = vld [vmem:[%s2679_s5 + $0x188] sm:$0xff]  ;;  %v1660_v3 = vpack.c.bf16 %v812_v61, %v811_v60  ;;  %v822_v60 = vld [vmem:[%s2679_s5 + $0x178] sm:$0xff]  ;;  %v610_v63 = vshrl.u32 %v609_v62, 7 }
  0x6e   :  { %1599 = vmatprep.subr.bf16.mxu0 %v1598_v15  ;;  %v1650_v11 = vpack.c.bf16 %v824_v9, %v823_v7  ;;  %v814_v9 = vld [vmem:[%s2679_s5 + $0x138] sm:$0xff] }
  0x6f   :  { %1585 = vmatpush1.bf16.msra.mxu1 %v1584_v1  ;;  %v830_v1 = vld [vmem:[%s2679_s5 + $0x1b8] sm:$0xff] }
  0x70   :  { %1619 = vmatprep.subr.bf16.mxu1 %v1618_v8  ;;  %v813_v8 = vld [vmem:[%s2679_s5 + $0x130] sm:$0xff] }
  0x71   :  { %1601 = vmatpush1.bf16.msra.mxu0 %v1600_v24 }
  0x72   :  { %1603 = vmatprep.subr.bf16.mxu0 %v1602_v29 }
  0x75   :  { %1605 = vmatpush1.bf16.msra.mxu0 %v1604_v36  ;;  %v794_v36 = vld [vmem:[%s2679_s5 + $0x98] sm:$0xff] }
  0x76   :  { %1607 = vmatprep.subr.bf16.mxu0 %v1606_v41  ;;  %v1620_v41 = vpack.c.bf16 %v776_v31, %v775_v30  ;;  %v1622_v46 = vpack.c.bf16 %v794_v36, %v793_v34  ;;  %v785_v30 = vld [vmem:[%s2679_s5 + $0x50] sm:$0xff]  ;;  %v786_v31 = vld [vmem:[%s2679_s5 + $0x58] sm:$0xff]  ;;  %v803_v36 = vld [vmem:[%s2679_s5 + $0xe0] sm:$0xff] }
  0x77   :  { %v817_v34 = vld [vmem:[%s2679_s5 + $0x150] sm:$0xff] }
  0x79   :  { %1609 = vmatpush1.bf16.msra.mxu0 %v1608_v48  ;;  %v809_v48 = vld [vmem:[%s2679_s5 + $0x110] sm:$0xff] }
  0x7a   :  { %1611 = vmatprep.subr.bf16.mxu0 %v1610_v52  ;;  %v827_v52 = vld [vmem:[%s2679_s5 + $0x1a0] sm:$0xff]  ;;  %v1656_v55 = vpack.c.bf16 %v810_v49, %v809_v48  ;;  %v820_v48 = vld [vmem:[%s2679_s5 + $0x168] sm:$0xff] }
  0x7b   :  { %v1658_v59 = vpack.c.bf16 %v828_v53, %v827_v52  ;;  %v837_v52 = vld [vmem:[%s2679_s5 + $0x1f0] sm:$0xff]  ;;  %v1646_v53 = vpack.c.bf16 %v806_v51, %v805_v50  ;;  %v1094_v50 = vld [vmem:[%s2684_s8] ss:$0 sm:$0xff] }
  0x7d   :  { %1613 = vmatpush1.bf16.msra.mxu0 %v1612_v56  ;;  %v779_v56 = vld [vmem:[%s2679_s5 + $0x20] sm:$0xff] }
  0x7e   :  { %1615 = vmatprep.subr.bf16.mxu0 %v1614_v0  ;;  %v829_v0 = vld [vmem:[%s2679_s5 + $0x1b0] sm:$0xff]  ;;  %v1628_v2 = vpack.c.bf16 %v780_v57, %v779_v56  ;;  %v790_v56 = vld [vmem:[%s2679_s5 + $0x78] sm:$0xff] }
  0x7f   :  { %v1662_v7 = vpack.c.bf16 %v830_v1, %v829_v0  ;;  %v611_v0 = vsub.s32 0, %v610_v63  ;;  %v619_v1 = vsub.s32 2, %v610_v63 }
  0x81   :  { %1617 = vmatpush1.bf16.msra.mxu0 %v1616_v4  ;;  %v781_v4 = vld [vmem:[%s2679_s5 + $0x30] sm:$0xff] }
  0x82   :  { %1651 = vmatprep.subr.bf16.mxu0 %v1650_v11  ;;  %v799_v11 = vld [vmem:[%s2679_s5 + $0xc0] sm:$0xff] }
  0xf7   :  { %v1129_v12 = vpop.f32.mrb[0].mxu0 }
  0xf8   :  { %v1130_v14 = vpop.f32.mrb[1].mxu0 }
  0xf9   :  { %v1164_v15 = vpop.f32.mrb[0].mxu1  ;;  %v1131_v16 = vadd.f32 %v1130_v14, %v1129_v12  ;;  %v800_v12 = vld [vmem:[%s2679_s5 + $0xc8] sm:$0xff] }
  0xfa   :  { %v1165_v18 = vpop.f32.mrb[1].mxu1  ;;  %v832_v14 = vld [vmem:[%s2679_s5 + $0x1c8] sm:$0xff] }
  0xfb   :  { %v1166_v19 = vadd.f32 %v1165_v18, %v1164_v15  ;;  %v259_v20 = vadd.f32 %v1131_v16, %v1092_v13  ;;  %v831_v13 = vld [vmem:[%s2679_s5 + $0x1c0] sm:$0xff]  ;;  %v1632_v15 = vpack.c.bf16 %v782_v5, %v781_v4  ;;  %v1664_v16 = vpack.c.bf16 %v814_v9, %v813_v8 }
  0xfc   :  { %v783_v18 = vld [vmem:[%s2679_s5 + $0x40] sm:$0xff]  ;;  %v623_v4 = vsub.s32 3, %v610_v63 }
  0xfd   :  { %v329_v21 = vadd.f32 %v1166_v19, %v259_v20  ;;  %v784_v19 = vld [vmem:[%s2679_s5 + $0x48] sm:$0xff]  ;;  %v1634_v20 = vpack.c.bf16 %v800_v12, %v799_v11 }
 0x117   :  { %v1199_v22 = vpop.f32.mrb[2].mxu0 }
 0x118   :  { %v1200_v23 = vpop.f32.mrb[3].mxu0 }
 0x119   :  { %v1234_v24 = vpop.f32.mrb[2].mxu1  ;;  %v1201_v25 = vadd.f32 %v1200_v23, %v1199_v22  ;;  %v815_v22 = vld [vmem:[%s2679_s5 + $0x140] sm:$0xff]  ;;  %v816_v23 = vld [vmem:[%s2679_s5 + $0x148] sm:$0xff] }
 0x11a   :  { %v1235_v26 = vpop.f32.mrb[3].mxu1 }
 0x11b   :  { %v1236_v27 = vadd.f32 %v1235_v26, %v1234_v24  ;;  %v399_v28 = vadd.f32 %v1201_v25, %v329_v21  ;;  %v1666_v21 = vpack.c.bf16 %v832_v14, %v831_v13  ;;  %v801_v24 = vld [vmem:[%s2679_s5 + $0xd0] sm:$0xff]  ;;  %v802_v25 = vld [vmem:[%s2679_s5 + $0xd8] sm:$0xff] }
 0x11c   :  { %v833_v26 = vld [vmem:[%s2679_s5 + $0x1d0] sm:$0xff]  ;;  %v1638_v32 = vpack.c.bf16 %v802_v25, %v801_v24 }
 0x11d   :  { %v469_v29 = vadd.f32 %v1236_v27, %v399_v28  ;;  %v834_v27 = vld [vmem:[%s2679_s5 + $0x1d8] sm:$0xff]  ;;  %v1636_v28 = vpack.c.bf16 %v784_v19, %v783_v18  ;;  %v988_v18 = vld [vmem:[%s2682_s7 + $0x8] sm:$0xff] }
 0x11e   :  { %v1670_v33 = vpack.c.bf16 %v834_v27, %v833_v26  ;;  %v989_v26 = vld [vmem:[%s2682_s7 + $0x10] sm:$0xff]  ;;  %v990_v27 = vld [vmem:[%s2682_s7 + $0x18] sm:$0xff] }
 0x137   :  { %v538_v35 = vpop.f32.mrb[4].mxu0 }
 0x138   :  { %v539_v39 = vadd.f32 %v538_v35, %v469_v29  ;;  %v1372_v40 = vpop.f32.mrb[5].mxu0  ;;  %v1668_v29 = vpack.c.bf16 %v816_v23, %v815_v22  ;;  %v818_v35 = vld [vmem:[%s2679_s5 + $0x158] sm:$0xff] }
 0x139   :  { %v1640_v40 = vpack.c.bf16 %v786_v31, %v785_v30  ;;  %v992_v30 = vld [vmem:[%s2682_s7 + $0x28] sm:$0xff] }
 0x13a   :  { %v542_v45 = vmax.f32 %v539_v39, 0.0  ;;  %v836_v39 = vld [vmem:[%s2679_s5 + $0x1e8] sm:$0xff] }
 0x13b   :  { %v1674_v43 = vpack.c.bf16 %v836_v39, %v835_v38  ;;  %v997_v38 = vld [vmem:[%s2682_s7 + $0x50] sm:$0xff]  ;;  %v998_v39 = vld [vmem:[%s2682_s7 + $0x58] sm:$0xff] }
 0x13c   :  { %694 = vmatmul.mubr.f32.vlgmr.msra.gmra.mrb[4].mxu1 %v542_v45  ;;  %765 = vmatmul.mubr.f32.vlgmr.msra.gmra.mrb[6].mxu0 %v542_v45  ;;  %v788_v45 = vld [vmem:[%s2679_s5 + $0x68] sm:$0xff] }
 0x13d   :  { %1621 = vmatpush3.bf16.msra.mxu1 %v1620_v41  ;;  %1653 = vmatpush3.bf16.msra.mxu0 %v1652_v42  ;;  %v1672_v41 = vpack.c.bf16 %v818_v35, %v817_v34  ;;  %v1642_v42 = vpack.c.bf16 %v804_v37, %v803_v36  ;;  %v995_v35 = vld [vmem:[%s2682_s7 + $0x40] sm:$0xff]  ;;  %v996_v36 = vld [vmem:[%s2682_s7 + $0x48] sm:$0xff] }
 0x13e   :  { %1623 = vmatprep.subr.bf16.mxu1 %v1622_v46  ;;  %1655 = vmatprep.subr.bf16.mxu0 %v1654_v47  ;;  %v819_v46 = vld [vmem:[%s2679_s5 + $0x160] sm:$0xff]  ;;  %v1644_v47 = vpack.c.bf16 %v788_v45, %v787_v44  ;;  %v1695_v37 = vpack.c.bf16 %v996_v36, %v995_v35 }
 0x13f   :  { %v1676_v49 = vpack.c.bf16 %v820_v48, %v819_v46 }
 0x141   :  { %1625 = vmatpush3.bf16.msra.mxu1 %v1624_v54  ;;  %1657 = vmatpush3.bf16.msra.mxu0 %v1656_v55  ;;  %v838_v54 = vld [vmem:[%s2679_s5 + $0x1f8] sm:$0xff]  ;;  %v789_v55 = vld [vmem:[%s2679_s5 + $0x70] sm:$0xff] }
 0x142   :  { %1627 = vmatprep.subr.bf16.mxu1 %v1626_v58  ;;  %1659 = vmatprep.subr.bf16.mxu0 %v1658_v59  ;;  %v1678_v57 = vpack.c.bf16 %v838_v54, %v837_v52  ;;  %v1648_v58 = vpack.c.bf16 %v790_v56, %v789_v55  ;;  %v821_v59 = vld [vmem:[%s2679_s5 + $0x170] sm:$0xff] }
 0x143   :  { %v1680_v61 = vpack.c.bf16 %v822_v60, %v821_v59 }
 0x145   :  { %1629 = vmatpush3.bf16.msra.mxu1 %v1628_v2  ;;  %1661 = vmatpush3.bf16.msra.mxu0 %v1660_v3  ;;  %v607_v2 = vld [vmem:[%s2681_s4] sm:$0xf]  ;;  %v615_v3 = vsub.s32 1, %v610_v63 }
 0x146   :  { %1631 = vmatprep.subr.bf16.mxu1 %v1630_v6  ;;  %1663 = vmatprep.subr.bf16.mxu0 %v1662_v7  ;;  %v612_v5 = vrot.slane %v607_v2, %v611_v0  ;;  %v620_v6 = vrot.slane %v607_v2, %v619_v1  ;;  %v624_v8 = vrot.slane %v607_v2, %v623_v4 }
 0x147   :  { %v616_v7 = vrot.slane %v607_v2, %v615_v3 }
 0x149   :  { %1633 = vmatpush3.bf16.msra.mxu1 %v1632_v15  ;;  %1665 = vmatpush3.bf16.msra.mxu0 %v1664_v16  ;;  %v987_v16 = vld [vmem:[%s2682_s7] sm:$0xff] }
 0x14a   :  { %1635 = vmatprep.subr.bf16.mxu1 %v1634_v20  ;;  %1667 = vmatprep.subr.bf16.mxu0 %v1666_v21  ;;  %v1683_v23 = vpack.c.bf16 %v988_v18, %v987_v16 }
 0x14d   :  { %1637 = vmatpush3.bf16.msra.mxu1 %v1636_v28  ;;  %1669 = vmatpush3.bf16.msra.mxu0 %v1668_v29  ;;  %v1686_v28 = vpack.c.bf16 %v990_v27, %v989_v26  ;;  %v991_v29 = vld [vmem:[%s2682_s7 + $0x20] sm:$0xff] }
 0x14e   :  { %1639 = vmatprep.subr.bf16.mxu1 %v1638_v32  ;;  %1671 = vmatprep.subr.bf16.mxu0 %v1670_v33  ;;  %v1689_v31 = vpack.c.bf16 %v992_v30, %v991_v29  ;;  %v993_v32 = vld [vmem:[%s2682_s7 + $0x30] sm:$0xff]  ;;  %v994_v33 = vld [vmem:[%s2682_s7 + $0x38] sm:$0xff] }
 0x14f   :  { %v1692_v34 = vpack.c.bf16 %v994_v33, %v993_v32 }
 0x151   :  { %1641 = vmatpush3.bf16.msra.mxu1 %v1640_v40  ;;  %1673 = vmatpush3.bf16.msra.mxu0 %v1672_v41  ;;  %v1698_v40 = vpack.c.bf16 %v998_v39, %v997_v38  ;;  %v999_v41 = vld [vmem:[%s2682_s7 + $0x60] sm:$0xf] }
 0x152   :  { %1643 = vmatprep.subr.bf16.mxu1 %v1642_v42  ;;  %1675 = vmatprep.subr.bf16.mxu0 %v1674_v43  ;;  %v1093_v43 = vld [vmem:[%s2683_s6] ss:$0 sm:$0xff] }
 0x155   :  { %1645 = vmatpush3.bf16.msra.mxu1 %v1644_v47  ;;  %1677 = vmatpush3.bf16.msra.mxu0 %v1676_v49 }
 0x156   :  { %1647 = vmatprep.subr.bf16.mxu1 %v1646_v53  ;;  %1679 = vmatprep.subr.bf16.mxu0 %v1678_v57 }
 0x159   :  { %1649 = vmatpush3.bf16.msra.mxu1 %v1648_v58  ;;  %1681 = vmatpush3.bf16.msra.mxu0 %v1680_v61 }
 0x15a   :  { %1682 = vmatprep.subr.bf16.mxu1 %v1705_v10 }
 0x20f   :  { %v695_v9 = vpop.f32.mrb[4].mxu1  ;;  %v766_v11 = vpop.f32.mrb[6].mxu0 }
 0x210   :  { %v696_v12 = vadd.f32 %v695_v9, %v612_v5  ;;  %v767_v13 = vadd.f32 %v766_v11, %v620_v6  ;;  %v697_v14 = vpop.f32.mrb[5].mxu1  ;;  %v768_v15 = vpop.f32.mrb[7].mxu0 }
 0x211   :  { %v698_v19 = vadd.f32 %v697_v14, %v616_v7  ;;  %v769_v20 = vadd.f32 %v768_v15, %v624_v8 }
 0x212   :  { %v771_v24 = vmax.f32 %v696_v12, 0.0  ;;  %v773_v25 = vmax.f32 %v767_v13, 0.0 }
 0x213   :  { %v772_v21 = vmax.f32 %v698_v19, 0.0  ;;  %v774_v22 = vmax.f32 %v769_v20, 0.0 }
 0x215   :  { %910 = vmatprep.mubr.f32.mxu1 %v772_v21  ;;  %980 = vmatprep.mubr.f32.mxu0 %v774_v22 }
 0x216   :  { %911 = vmatmul.mubr.f32.vlgmr.msra.gmra.mrb[6].mxu1 %v771_v24  ;;  %981 = vmatmul.mubr.f32.vlgmr.msra.gmra.mrb[8].mxu0 %v773_v25 }
 0x217   :  { %1684 = vmatpush3.bf16.msra.mxu1 %v1683_v23  ;;  %1399 = vmatprep.mubr.msk.f32.mxu1 %vm1706_vm0, %v1707_v17 }
 0x218   :  { %1685 = vmatprep.subr.bf16.mxu1 %v1705_v10 }
 0x21b   :  { %1687 = vmatpush3.bf16.msra.mxu1 %v1686_v28 }
 0x21c   :  { %1688 = vmatprep.subr.bf16.mxu1 %v1705_v10 }
 0x21f   :  { %1690 = vmatpush3.bf16.msra.mxu1 %v1689_v31 }
 0x220   :  { %1691 = vmatprep.subr.bf16.mxu1 %v1705_v10 }
 0x223   :  { %1693 = vmatpush3.bf16.msra.mxu1 %v1692_v34 }
 0x224   :  { %1694 = vmatprep.subr.bf16.mxu1 %v1705_v10 }
 0x227   :  { %1696 = vmatpush3.bf16.msra.mxu1 %v1695_v37 }
 0x228   :  { %1697 = vmatprep.subr.bf16.mxu1 %v1705_v10 }
 0x22b   :  { %1699 = vmatpush3.bf16.msra.mxu1 %v1698_v40 }
 0x22c   :  { %1397 = vmatprep.subr.mxu1 %v1707_v17 }
 0x22f   :  { %1398 = vmatpush3.msk.msra.mxu1 %vm1011_vm1, %v999_v41 }
 0x2e9   :  { %v1286_v42 = vpop.f32.mrb[6].mxu1  ;;  %v1321_v10 = vpop.f32.mrb[8].mxu0 }
 0x2ea   :  { %v1287_v44 = vpop.f32.mrb[7].mxu1  ;;  %v1322_v45 = vpop.f32.mrb[9].mxu0 }
 0x2eb   :  { %v1288_v46 = vadd.f32 %v1287_v44, %v1286_v42  ;;  %v1323_v47 = vadd.f32 %v1322_v45, %v1321_v10 }
 0x2ed   :  { %v913_v48 = vadd.f32 %v1288_v46, %v1093_v43 }
 0x2ef   :  { %v983_v49 = vadd.f32 %v1323_v47, %v913_v48 }
 0x2f1   :  { %v986_v17 = vmax.f32 %v983_v49, 0.0 }
 0x2f3   :  { %1400 = vmatmul.mubr.msk.f32.vlgmr.msra.gmra.mrb[8].mxu1 %vm1007_vm2, %v986_v17 }
 0x3c6   :  { %v1081_v51 = vpop.f32.mrb[8].mxu1 }
 0x3c7   :  { %v1082_v52 = vadd.f32 %v1094_v50, %v1081_v51  ;;  %v1401_v53 = vpop.f32.mrb[9].mxu1 }
 0x3c9   :  { %1703 = vtanh.f32 %v1082_v52 }
 0x3d3   :  { %v1704_v54 = vpop.eup %1703 }
 0x3d4   :  { %1087 = vst.msk [vmem:[%s2685_s9] sm:$0xff] %vm1086_vm3, %v1704_v54 }

</bundles_post_ra>
